<compile_context>
chip_gen: v5e
topology: v5e:2x2
jax: 0.10.0
libtpu: 0.0.40
codegen_flags: <defaults>
</compile_context>

<pallas_src>
import functools

import numpy as np
import jax
import jax.numpy as jnp
from jax.experimental import pallas as pl
from jax.experimental.pallas import tpu as pltpu


def _round_up(v, m):
    return ((v + m - 1) // m) * m


def _vmem_limit():
    """Generation-aware VMEM budget (~3/4 of physical, capped at 100 MiB)."""
    try:
        cap = int(pltpu.get_tpu_info().vmem_capacity_bytes)
    except Exception:
        cap = 64 * 1024 * 1024
    return int(min(cap * 3 // 4, 100 * 1024 * 1024))


def _choose_tiles(n_pad):
    """Largest 128-multiple tiles that divide n_pad; keep >=2 row tiles (v7x megacore)."""
    tm = 128
    for cand in (512, 256):
        if n_pad % cand == 0 and n_pad // cand >= 2:
            tm = cand
            break
    tk = 128
    for cand in (512, 256):
        if n_pad % cand == 0:
            tk = cand
            break
    return tm, tk


def _tile_schedule(a_np, tm, tk):
    """Host-side block-diagonal schedule: per row tile, the contiguous range of
    nonzero K tiles.  kidx[i, k] = clamped K-tile index, klen[i] = valid count."""
    n_pad = a_np.shape[0]
    n_rows, n_k = n_pad // tm, n_pad // tk
    occ = (a_np.reshape(n_rows, tm, n_k, tk) != 0.0).any(axis=(1, 3))
    klo = np.zeros((n_rows,), np.int32)
    klen = np.ones((n_rows,), np.int32)
    for r in range(n_rows):
        nz = np.nonzero(occ[r])[0]
        if nz.size:
            klo[r] = nz[0]
            klen[r] = nz[-1] - nz[0] + 1
    kmax = int(klen.max())
    kk = np.arange(kmax, dtype=np.int32)[None, :]
    kidx = (klo[:, None] + np.minimum(kk, klen[:, None] - 1)).astype(np.int32)
    return kidx, klen, kmax


# --------------------------------------------------------------------------- #
# Kernel 1: hw2 = relu(A_hat @ (X @ W1) + b1) @ W2      (X@W1 and H1@W2 fused)
# --------------------------------------------------------------------------- #
def _layer1_kernel(kidx_ref, klen_ref, a_ref, x_ref, w1_ref, b1_ref, w2_ref,
                   o_ref, acc_ref):
    i = pl.program_id(0)
    k = pl.program_id(1)
    klen = klen_ref[i]

    @pl.when(k == 0)
    def _():
        acc_ref[...] = jnp.zeros_like(acc_ref)

    @pl.when(k < klen)          # skip clamped (zero-block) steps of block-diag A
    def _():
        y = jnp.dot(x_ref[...], w1_ref[...],
                    preferred_element_type=jnp.float32)          # (tk, H) f32
        acc_ref[...] += jnp.dot(a_ref[...], y.astype(a_ref.dtype),
                                preferred_element_type=jnp.float32)

    @pl.when(k == klen - 1)     # epilogue on last *valid* K step
    def _():
        h1 = jnp.maximum(acc_ref[...] + b1_ref[...], 0.0)
        # dropout(p=0.3, training=False) -> identity (eval mode)
        o_ref[...] = jnp.dot(h1.astype(w2_ref.dtype), w2_ref[...],
                             preferred_element_type=jnp.float32).astype(o_ref.dtype)


def layer1_fused(kidx, klen, a_hat, x, w1, b1, w2, *, tm, tk, kmax,
                 out_dtype=jnp.bfloat16):
    n_pad = a_hat.shape[0]
    c_in = x.shape[1]
    hidden = w1.shape[1]
    num_rows = n_pad // tm
    return pl.pallas_call(
        _layer1_kernel,
        out_shape=jax.ShapeDtypeStruct((n_pad, hidden), out_dtype),
        grid_spec=pltpu.PrefetchScalarGridSpec(
            num_scalar_prefetch=2,
            grid=(num_rows, kmax),
            in_specs=[
                pl.BlockSpec((tm, tk), lambda i, k, ks, kl: (i, ks[i, k])),
                pl.BlockSpec((tk, c_in), lambda i, k, ks, kl: (ks[i, k], 0)),
                pl.BlockSpec((c_in, hidden), lambda i, k, ks, kl: (0, 0)),   # W1 resident
                pl.BlockSpec((1, hidden), lambda i, k, ks, kl: (0, 0)),      # b1 resident
                pl.BlockSpec((hidden, hidden), lambda i, k, ks, kl: (0, 0)), # W2 resident
            ],
            out_specs=pl.BlockSpec((tm, hidden), lambda i, k, ks, kl: (i, 0)),
            scratch_shapes=[pltpu.VMEM((tm, hidden), jnp.float32)],
        ),
        compiler_params=pltpu.CompilerParams(
            dimension_semantics=("parallel", "arbitrary"),
            vmem_limit_bytes=_vmem_limit(),
        ),
    )(kidx, klen, a_hat, x, w1, b1, w2)


# --------------------------------------------------------------------------- #
# Kernel 2: out = (pool @ (A_hat @ hw2 + b2)) @ W_lin + b_lin
#           (conv2 propagation + global_mean_pool + Linear fused; h2 stays in VMEM)
# --------------------------------------------------------------------------- #
def _layer2_pool_kernel(kidx_ref, klen_ref, a_ref, y_ref, pool_ref, b2_ref,
                        wl_ref, bl_ref, o_ref, acc_ref, pooled_ref):
    i = pl.program_id(0)
    k = pl.program_id(1)
    klen = klen_ref[i]

    @pl.when(jnp.logical_and(i == 0, k == 0))
    def _():
        pooled_ref[...] = jnp.zeros_like(pooled_ref)

    @pl.when(k == 0)
    def _():
        acc_ref[...] = jnp.zeros_like(acc_ref)

    @pl.when(k < klen)
    def _():
        acc_ref[...] += jnp.dot(a_ref[...], y_ref[...],
                                preferred_element_type=jnp.float32)

    @pl.when(k == klen - 1)     # per-row-tile epilogue: fold h2 tile into pooled acc
    def _():
        h2 = acc_ref[...] + b2_ref[...]
        pooled_ref[...] += jnp.dot(pool_ref[...], h2.astype(pool_ref.dtype),
                                   preferred_element_type=jnp.float32)

    @pl.when(jnp.logical_and(i == pl.num_programs(0) - 1, k == klen - 1))
    def _():                    # final Linear once, bf16 inputs / f32 accumulation
        o_ref[...] = (jnp.dot(pooled_ref[...].astype(wl_ref.dtype), wl_ref[...],
                              preferred_element_type=jnp.float32)
                      + bl_ref[...]).astype(o_ref.dtype)


def layer2_pool_fused(kidx, klen, a_hat, y, pool, b2, w_lin, b_lin, *, tm, tk, kmax):
    n_pad = a_hat.shape[0]
    hidden = y.shape[1]
    g_pad = pool.shape[0]
    c_out_pad = w_lin.shape[1]
    num_rows = n_pad // tm
    return pl.pallas_call(
        _layer2_pool_kernel,
        out_shape=jax.ShapeDtypeStruct((g_pad, c_out_pad), jnp.float32),
        grid_spec=pltpu.PrefetchScalarGridSpec(
            num_scalar_prefetch=2,
            grid=(num_rows, kmax),
            in_specs=[
                pl.BlockSpec((tm, tk), lambda i, k, ks, kl: (i, ks[i, k])),
                pl.BlockSpec((tk, hidden), lambda i, k, ks, kl: (ks[i, k], 0)),
                pl.BlockSpec((g_pad, tm), lambda i, k, ks, kl: (0, i)),
                pl.BlockSpec((1, hidden), lambda i, k, ks, kl: (0, 0)),          # b2
                pl.BlockSpec((hidden, c_out_pad), lambda i, k, ks, kl: (0, 0)),  # W_lin
                pl.BlockSpec((1, c_out_pad), lambda i, k, ks, kl: (0, 0)),       # b_lin
            ],
            out_specs=pl.BlockSpec((g_pad, c_out_pad), lambda i, k, ks, kl: (0, 0)),
            scratch_shapes=[pltpu.VMEM((tm, hidden), jnp.float32),    # per-row-tile acc
                            pltpu.VMEM((g_pad, hidden), jnp.float32)],  # pooled acc
        ),
        compiler_params=pltpu.CompilerParams(
            # pooled accumulator is carried across row tiles -> row axis must be
            # "arbitrary" (a "parallel" row axis would split it across v7x cores).
            dimension_semantics=("arbitrary", "arbitrary"),
            vmem_limit_bytes=_vmem_limit(),
        ),
    )(kidx, klen, a_hat, y, pool, b2, w_lin, b_lin)


# --------------------------------------------------------------------------- #
# jitted kernel pipeline (preprocessing hoisted out)
# --------------------------------------------------------------------------- #
@functools.partial(jax.jit, static_argnames=("tm", "tk", "kmax"))
def _gcn_pipeline(kidx, klen, a_bf, x_bf, pool_bf,
                  w1_bf, b1, w2_bf, b2, wl_bf, bl, *, tm, tk, kmax):
    hw2 = layer1_fused(kidx, klen, a_bf, x_bf, w1_bf, b1, w2_bf,
                       tm=tm, tk=tk, kmax=kmax)
    return layer2_pool_fused(kidx, klen, a_bf, hw2, pool_bf, b2, wl_bf, bl,
                             tm=tm, tk=tk, kmax=kmax)


# --------------------------------------------------------------------------- #
# Plain-JAX / host graph preprocessing (glue only, outside the hot path)
# --------------------------------------------------------------------------- #
def build_normalized_adjacency(edge_index, num_nodes):
    """Dense D^-1/2 (A + I) D^-1/2 matching PyG GCNConv default normalization."""
    src = edge_index[0]
    dst = edge_index[1]
    a = jnp.zeros((num_nodes, num_nodes), dtype=jnp.float32)
    a = a.at[dst, src].add(1.0)                      # message flows src -> dst
    a = a + jnp.eye(num_nodes, dtype=jnp.float32)    # add self loops
    deg = jnp.sum(a, axis=1)
    d_inv_sqrt = jnp.where(deg > 0, 1.0 / jnp.sqrt(deg), 0.0)
    return d_inv_sqrt[:, None] * a * d_inv_sqrt[None, :]


def build_pool_matrix(batch, num_graphs, num_nodes):
    """(G, N) matrix with row g = (batch == g) / count_g  => global_mean_pool."""
    one_hot = (batch[None, :] == jnp.arange(num_graphs)[:, None]).astype(jnp.float32)
    counts = jnp.maximum(jnp.sum(one_hot, axis=1, keepdims=True), 1.0)
    return one_hot / counts


def preprocess(x, edge_index, batch, num_graphs):
    """Dense normalized A, pooling matrix, padding, bf16 casts and tile schedule."""
    n, c_in = x.shape
    a_hat = build_normalized_adjacency(edge_index, n)
    pool = build_pool_matrix(batch, num_graphs, n)

    n_pad = _round_up(n, 128)
    tm, tk = _choose_tiles(n_pad)
    g_pad = _round_up(num_graphs, 8)

    a_pad = jnp.zeros((n_pad, n_pad), jnp.float32).at[:n, :n].set(a_hat)
    x_pad = jnp.zeros((n_pad, c_in), jnp.float32).at[:n, :].set(x)
    pool_pad = jnp.zeros((g_pad, n_pad), jnp.float32).at[:num_graphs, :n].set(pool)

    kidx, klen, kmax = _tile_schedule(np.asarray(jax.device_get(a_pad)), tm, tk)

    return dict(a=a_pad.astype(jnp.bfloat16), x=x_pad.astype(jnp.bfloat16),
                pool=pool_pad.astype(jnp.bfloat16),
                kidx=jnp.asarray(kidx), klen=jnp.asarray(klen),
                tm=tm, tk=tk, kmax=kmax)


def gcn_forward(x, edge_index, batch, params, num_graphs):
    w1, b1, w2, b2, w_lin, b_lin = params
    hidden = w1.shape[1]
    c_out = w_lin.shape[1]
    c_out_pad = _round_up(c_out, 128)

    prep = preprocess(x, edge_index, batch, num_graphs)

    wl_pad = jnp.zeros((hidden, c_out_pad), jnp.float32).at[:, :c_out].set(w_lin)
    bl_pad = jnp.zeros((1, c_out_pad), jnp.float32).at[:, :c_out].set(b_lin)

    out_pad = _gcn_pipeline(
        prep["kidx"], prep["klen"], prep["a"], prep["x"], prep["pool"],
        w1.astype(jnp.bfloat16), b1, w2.astype(jnp.bfloat16), b2,
        wl_pad.astype(jnp.bfloat16), bl_pad,
        tm=prep["tm"], tk=prep["tk"], kmax=prep["kmax"])

    return out_pad[:num_graphs, :c_out]


def gcn_reference(x, edge_index, batch, params, num_graphs):
    """Pure-JAX f32 reference for correctness checking."""
    w1, b1, w2, b2, w_lin, b_lin = params
    n = x.shape[0]
    a_hat = build_normalized_adjacency(edge_index, n)
    pool = build_pool_matrix(batch, num_graphs, n)
    h1 = jnp.maximum(a_hat @ (x @ w1) + b1, 0.0)
    h2 = a_hat @ (h1 @ w2) + b2
    return (pool @ h2) @ w_lin + b_lin


def init_params(key, in_channels, hidden_channels, out_channels):
    k1, k2, k3 = jax.random.split(key, 3)

    def glorot(k, shape):
        fan_in, fan_out = shape
        limit = jnp.sqrt(6.0 / (fan_in + fan_out))
        return jax.random.uniform(k, shape, jnp.float32, -limit, limit)

    w1 = glorot(k1, (in_channels, hidden_channels))
    b1 = jnp.zeros((1, hidden_channels), jnp.float32)
    w2 = glorot(k2, (hidden_channels, hidden_channels))
    b2 = jnp.zeros((1, hidden_channels), jnp.float32)
    w_lin = glorot(k3, (hidden_channels, out_channels))
    b_lin = jnp.zeros((1, out_channels), jnp.float32)
    return (w1, b1, w2, b2, w_lin, b_lin)


if __name__ == "__main__":
    key = jax.random.PRNGKey(0)
    k_x, k_e1, k_e2, k_p = jax.random.split(key, 4)

    # 6 graphs x 96 nodes: deliberately NOT tile-aligned so the data-dependent
    # block-diagonal skip schedule (varying klo / klen, clamped steps) is exercised.
    num_graphs = 6
    nodes_per_graph = 96
    num_nodes = num_graphs * nodes_per_graph        # 576 -> padded to 640
    num_edges = 2048
    in_channels = 16
    hidden_channels = 128                            # PyTorch default
    out_channels = 1

    x = jax.random.normal(k_x, (num_nodes, in_channels), jnp.float32)

    # random edges confined within each graph (PyG-style batched graphs)
    e_graph = jax.random.randint(k_e1, (num_edges,), 0, num_graphs, jnp.int32)
    e_local = jax.random.randint(k_e2, (2, num_edges), 0, nodes_per_graph, jnp.int32)
    edge_index = (e_local + e_graph[None, :] * nodes_per_graph).astype(jnp.int32)
    batch = jnp.repeat(jnp.arange(num_graphs, dtype=jnp.int32), nodes_per_graph)

    params = init_params(k_p, in_channels, hidden_channels, out_channels)

    out = gcn_forward(x, edge_index, batch, params, num_graphs)
    out = jax.block_until_ready(out)
    assert out.shape == (num_graphs, out_channels)

    ref = gcn_reference(x, edge_index, batch, params, num_graphs)
    max_err = float(jnp.max(jnp.abs(out - ref)))
    assert jnp.allclose(out, ref, rtol=5e-2, atol=7.5e-2), f"max abs err = {max_err}"

    print("KERNEL_OK")
</pallas_src>

<mosaic_0001>
module attributes {stable_mosaic.version = 11 : i64} {
  func.func @_layer1_kernel(%arg0: i32, %arg1: i32, %arg2: memref<5x3xi32, #tpu.memory_space<smem>>, %arg3: memref<5xi32, #tpu.memory_space<smem>>, %arg4: memref<128x128xbf16, #tpu.memory_space<vmem>>, %arg5: memref<128x16xbf16, #tpu.memory_space<vmem>>, %arg6: memref<16x128xbf16, #tpu.memory_space<vmem>>, %arg7: memref<1x128xf32, #tpu.memory_space<vmem>>, %arg8: memref<128x128xbf16, #tpu.memory_space<vmem>>, %arg9: memref<128x128xbf16, #tpu.memory_space<vmem>>, %arg10: memref<128x128xf32, #tpu.memory_space<vmem>>) attributes {dimension_semantics = [#tpu.dimension_semantics<parallel>, #tpu.dimension_semantics<arbitrary>], iteration_bounds = array<i64: 5, 3>, scalar_prefetch = 2 : i64, scratch_operands = 1 : i64, tpu.core_type = #tpu.core_type<tc>, window_params = [{transform_indices = @transform_0, window_bounds = array<i64: 128, 128>}, {transform_indices = @transform_1, window_bounds = array<i64: 128, 16>}, {pipeline_mode = #tpu.pipeline_mode<synchronous>, transform_indices = @transform_2, window_bounds = array<i64: 16, 128>}, {pipeline_mode = #tpu.pipeline_mode<synchronous>, transform_indices = @transform_3, window_bounds = array<i64: 1, 128>}, {pipeline_mode = #tpu.pipeline_mode<synchronous>, transform_indices = @transform_4, window_bounds = array<i64: 128, 128>}, {transform_indices = @transform_5, window_bounds = array<i64: 128, 128>}]} {
    %0 = arith.index_cast %arg0 : i32 to index
    %1 = memref.load %arg3[%0] : memref<5xi32, #tpu.memory_space<smem>>
    %c0_i32 = arith.constant 0 : i32
    %2 = arith.cmpi eq, %arg1, %c0_i32 : i32
    %3 = arith.extui %2 : i1 to i32
    %c0_i32_0 = arith.constant 0 : i32
    %4 = arith.cmpi ne, %3, %c0_i32_0 : i32
    scf.if %4 {
      %cst = arith.constant 0.000000e+00 : f32
      %12 = vector.broadcast %cst : f32 to vector<128x128xf32>
      %c0 = arith.constant 0 : index
      %c0_3 = arith.constant 0 : index
      %13 = vector.load %arg10[%c0, %c0_3] : memref<128x128xf32, #tpu.memory_space<vmem>>, vector<128x128xf32>
      tpu.vector_store %arg10[%c0, %c0_3], %12 {strides = array<i32>} : memref<128x128xf32, #tpu.memory_space<vmem>>, vector<128x128xf32>,
    } else {
    }
    %5 = arith.cmpi slt, %arg1, %1 : i32
    %6 = arith.extui %5 : i1 to i32
    %c0_i32_1 = arith.constant 0 : i32
    %7 = arith.cmpi ne, %6, %c0_i32_1 : i32
    scf.if %7 {
      %c0 = arith.constant 0 : index
      %c0_3 = arith.constant 0 : index
      %12 = vector.load %arg5[%c0, %c0_3] : memref<128x16xbf16, #tpu.memory_space<vmem>>, vector<128x16xbf16>
      %c0_4 = arith.constant 0 : index
      %c0_5 = arith.constant 0 : index
      %13 = vector.load %arg6[%c0_4, %c0_5] : memref<16x128xbf16, #tpu.memory_space<vmem>>, vector<16x128xbf16>
      %cst = arith.constant dense<0.000000e+00> : vector<128x128xf32>
      %14 = tpu.matmul %12, %13, %cst {dimension_numbers = #tpu.dot_dimension_numbers<[1], [0], [0], [1], [0, 0, 1, 1], [], []>} : vector<128x16xbf16>, vector<16x128xbf16>, vector<128x128xf32> -> vector<128x128xf32>
      %c0_6 = arith.constant 0 : index
      %c0_7 = arith.constant 0 : index
      %15 = vector.load %arg10[%c0_6, %c0_7] : memref<128x128xf32, #tpu.memory_space<vmem>>, vector<128x128xf32>
      %c0_8 = arith.constant 0 : index
      %c0_9 = arith.constant 0 : index
      %16 = vector.load %arg4[%c0_8, %c0_9] : memref<128x128xbf16, #tpu.memory_space<vmem>>, vector<128x128xbf16>
      %17 = arith.truncf %14 : vector<128x128xf32> to vector<128x128xbf16>
      %cst_10 = arith.constant dense<0.000000e+00> : vector<128x128xf32>
      %18 = tpu.matmul %16, %17, %cst_10 {dimension_numbers = #tpu.dot_dimension_numbers<[1], [0], [0], [1], [0, 0, 1, 1], [], []>} : vector<128x128xbf16>, vector<128x128xbf16>, vector<128x128xf32> -> vector<128x128xf32>
      %19 = arith.addf %15, %18 : vector<128x128xf32>
      %c0_11 = arith.constant 0 : index
      %c0_12 = arith.constant 0 : index
      %20 = vector.load %arg10[%c0_11, %c0_12] : memref<128x128xf32, #tpu.memory_space<vmem>>, vector<128x128xf32>
      tpu.vector_store %arg10[%c0_11, %c0_12], %19 {strides = array<i32>} : memref<128x128xf32, #tpu.memory_space<vmem>>, vector<128x128xf32>,
    } else {
    }
    %c1_i32 = arith.constant 1 : i32
    %8 = arith.subi %1, %c1_i32 : i32
    %9 = arith.cmpi eq, %arg1, %8 : i32
    %10 = arith.extui %9 : i1 to i32
    %c0_i32_2 = arith.constant 0 : i32
    %11 = arith.cmpi ne, %10, %c0_i32_2 : i32
    scf.if %11 {
      %c0 = arith.constant 0 : index
      %c0_3 = arith.constant 0 : index
      %12 = vector.load %arg10[%c0, %c0_3] : memref<128x128xf32, #tpu.memory_space<vmem>>, vector<128x128xf32>
      %c0_4 = arith.constant 0 : index
      %c0_5 = arith.constant 0 : index
      %13 = vector.load %arg7[%c0_4, %c0_5] : memref<1x128xf32, #tpu.memory_space<vmem>>, vector<1x128xf32>
      %14 = vector.broadcast %13 : vector<1x128xf32> to vector<128x128xf32>
      %15 = arith.addf %12, %14 : vector<128x128xf32>
      %cst = arith.constant 0.000000e+00 : f32
      %16 = vector.broadcast %cst : f32 to vector<128x128xf32>
      %17 = arith.maximumf %15, %16 : vector<128x128xf32>
      %18 = arith.truncf %17 : vector<128x128xf32> to vector<128x128xbf16>
      %c0_6 = arith.constant 0 : index
      %c0_7 = arith.constant 0 : index
      %19 = vector.load %arg8[%c0_6, %c0_7] : memref<128x128xbf16, #tpu.memory_space<vmem>>, vector<128x128xbf16>
      %cst_8 = arith.constant dense<0.000000e+00> : vector<128x128xf32>
      %20 = tpu.matmul %18, %19, %cst_8 {dimension_numbers = #tpu.dot_dimension_numbers<[1], [0], [0], [1], [0, 0, 1, 1], [], []>} : vector<128x128xbf16>, vector<128x128xbf16>, vector<128x128xf32> -> vector<128x128xf32>
      %21 = arith.truncf %20 : vector<128x128xf32> to vector<128x128xbf16>
      %c0_9 = arith.constant 0 : index
      %c0_10 = arith.constant 0 : index
      %22 = vector.load %arg9[%c0_9, %c0_10] : memref<128x128xbf16, #tpu.memory_space<vmem>>, vector<128x128xbf16>
      tpu.vector_store %arg9[%c0_9, %c0_10], %21 {strides = array<i32>} : memref<128x128xbf16, #tpu.memory_space<vmem>>, vector<128x128xbf16>,
    } else {
    }
    return
  }
  func.func @transform_0(%arg0: i32, %arg1: i32, %arg2: memref<5x3xi32, #tpu.memory_space<smem>>, %arg3: memref<5xi32, #tpu.memory_space<smem>>) -> (i32, i32) {
    %0 = arith.index_cast %arg0 : i32 to index
    %1 = arith.index_cast %arg1 : i32 to index
    %2 = memref.load %arg2[%0, %1] : memref<5x3xi32, #tpu.memory_space<smem>>
    %c0_i32 = arith.constant 0 : i32
    return %arg0, %2 : i32, i32
  }
  func.func @transform_1(%arg0: i32, %arg1: i32, %arg2: memref<5x3xi32, #tpu.memory_space<smem>>, %arg3: memref<5xi32, #tpu.memory_space<smem>>) -> (i32, i32) {
    %0 = arith.index_cast %arg0 : i32 to index
    %1 = arith.index_cast %arg1 : i32 to index
    %2 = memref.load %arg2[%0, %1] : memref<5x3xi32, #tpu.memory_space<smem>>
    %c0_i32 = arith.constant 0 : i32
    %c0_i32_0 = arith.constant 0 : i32
    return %2, %c0_i32 : i32, i32
  }
  func.func @transform_2(%arg0: i32, %arg1: i32, %arg2: memref<5x3xi32, #tpu.memory_space<smem>>, %arg3: memref<5xi32, #tpu.memory_space<smem>>) -> (i32, i32) {
    %c0_i32 = arith.constant 0 : i32
    %c0_i32_0 = arith.constant 0 : i32
    %c0_i32_1 = arith.constant 0 : i32
    return %c0_i32, %c0_i32_0 : i32, i32
  }
  func.func @transform_3(%arg0: i32, %arg1: i32, %arg2: memref<5x3xi32, #tpu.memory_space<smem>>, %arg3: memref<5xi32, #tpu.memory_space<smem>>) -> (i32, i32) {
    %c0_i32 = arith.constant 0 : i32
    %c0_i32_0 = arith.constant 0 : i32
    %c0_i32_1 = arith.constant 0 : i32
    return %c0_i32, %c0_i32_0 : i32, i32
  }
  func.func @transform_4(%arg0: i32, %arg1: i32, %arg2: memref<5x3xi32, #tpu.memory_space<smem>>, %arg3: memref<5xi32, #tpu.memory_space<smem>>) -> (i32, i32) {
    %c0_i32 = arith.constant 0 : i32
    %c0_i32_0 = arith.constant 0 : i32
    %c0_i32_1 = arith.constant 0 : i32
    return %c0_i32, %c0_i32_0 : i32, i32
  }
  func.func @transform_5(%arg0: i32, %arg1: i32, %arg2: memref<5x3xi32, #tpu.memory_space<smem>>, %arg3: memref<5xi32, #tpu.memory_space<smem>>) -> (i32, i32) {
    %c0_i32 = arith.constant 0 : i32
    %c0_i32_0 = arith.constant 0 : i32
    return %arg0, %c0_i32 : i32, i32
  }
}

module attributes {stable_mosaic.version = 11 : i64} {
  func.func @_layer2_pool_kernel(%arg0: i32, %arg1: i32, %arg2: memref<5x3xi32, #tpu.memory_space<smem>>, %arg3: memref<5xi32, #tpu.memory_space<smem>>, %arg4: memref<128x128xbf16, #tpu.memory_space<vmem>>, %arg5: memref<128x128xbf16, #tpu.memory_space<vmem>>, %arg6: memref<8x128xbf16, #tpu.memory_space<vmem>>, %arg7: memref<1x128xf32, #tpu.memory_space<vmem>>, %arg8: memref<128x128xbf16, #tpu.memory_space<vmem>>, %arg9: memref<1x128xf32, #tpu.memory_space<vmem>>, %arg10: memref<8x128xf32, #tpu.memory_space<vmem>>, %arg11: memref<128x128xf32, #tpu.memory_space<vmem>>, %arg12: memref<8x128xf32, #tpu.memory_space<vmem>>) attributes {dimension_semantics = [#tpu.dimension_semantics<arbitrary>, #tpu.dimension_semantics<arbitrary>], iteration_bounds = array<i64: 5, 3>, scalar_prefetch = 2 : i64, scratch_operands = 2 : i64, tpu.core_type = #tpu.core_type<tc>, window_params = [{transform_indices = @transform_0, window_bounds = array<i64: 128, 128>}, {transform_indices = @transform_1, window_bounds = array<i64: 128, 128>}, {transform_indices = @transform_2, window_bounds = array<i64: 8, 128>}, {pipeline_mode = #tpu.pipeline_mode<synchronous>, transform_indices = @transform_3, window_bounds = array<i64: 1, 128>}, {pipeline_mode = #tpu.pipeline_mode<synchronous>, transform_indices = @transform_4, window_bounds = array<i64: 128, 128>}, {pipeline_mode = #tpu.pipeline_mode<synchronous>, transform_indices = @transform_5, window_bounds = array<i64: 1, 128>}, {pipeline_mode = #tpu.pipeline_mode<synchronous>, transform_indices = @transform_6, window_bounds = array<i64: 8, 128>}]} {
    %0 = arith.index_cast %arg0 : i32 to index
    %1 = memref.load %arg3[%0] : memref<5xi32, #tpu.memory_space<smem>>
    %c0_i32 = arith.constant 0 : i32
    %2 = arith.cmpi eq, %arg0, %c0_i32 : i32
    %c0_i32_0 = arith.constant 0 : i32
    %3 = arith.cmpi eq, %arg1, %c0_i32_0 : i32
    %4 = arith.andi %2, %3 : i1
    %5 = arith.extui %4 : i1 to i32
    %c0_i32_1 = arith.constant 0 : i32
    %6 = arith.cmpi ne, %5, %c0_i32_1 : i32
    scf.if %6 {
      %cst = arith.constant 0.000000e+00 : f32
      %23 = vector.broadcast %cst : f32 to vector<8x128xf32>
      %c0 = arith.constant 0 : index
      %c0_8 = arith.constant 0 : index
      %24 = vector.load %arg12[%c0, %c0_8] : memref<8x128xf32, #tpu.memory_space<vmem>>, vector<8x128xf32>
      tpu.vector_store %arg12[%c0, %c0_8], %23 {strides = array<i32>} : memref<8x128xf32, #tpu.memory_space<vmem>>, vector<8x128xf32>,
    } else {
    }
    %c0_i32_2 = arith.constant 0 : i32
    %7 = arith.cmpi eq, %arg1, %c0_i32_2 : i32
    %8 = arith.extui %7 : i1 to i32
    %c0_i32_3 = arith.constant 0 : i32
    %9 = arith.cmpi ne, %8, %c0_i32_3 : i32
    scf.if %9 {
      %cst = arith.constant 0.000000e+00 : f32
      %23 = vector.broadcast %cst : f32 to vector<128x128xf32>
      %c0 = arith.constant 0 : index
      %c0_8 = arith.constant 0 : index
      %24 = vector.load %arg11[%c0, %c0_8] : memref<128x128xf32, #tpu.memory_space<vmem>>, vector<128x128xf32>
      tpu.vector_store %arg11[%c0, %c0_8], %23 {strides = array<i32>} : memref<128x128xf32, #tpu.memory_space<vmem>>, vector<128x128xf32>,
    } else {
    }
    %10 = arith.cmpi slt, %arg1, %1 : i32
    %11 = arith.extui %10 : i1 to i32
    %c0_i32_4 = arith.constant 0 : i32
    %12 = arith.cmpi ne, %11, %c0_i32_4 : i32
    scf.if %12 {
      %c0 = arith.constant 0 : index
      %c0_8 = arith.constant 0 : index
      %23 = vector.load %arg11[%c0, %c0_8] : memref<128x128xf32, #tpu.memory_space<vmem>>, vector<128x128xf32>
      %c0_9 = arith.constant 0 : index
      %c0_10 = arith.constant 0 : index
      %24 = vector.load %arg4[%c0_9, %c0_10] : memref<128x128xbf16, #tpu.memory_space<vmem>>, vector<128x128xbf16>
      %c0_11 = arith.constant 0 : index
      %c0_12 = arith.constant 0 : index
      %25 = vector.load %arg5[%c0_11, %c0_12] : memref<128x128xbf16, #tpu.memory_space<vmem>>, vector<128x128xbf16>
      %cst = arith.constant dense<0.000000e+00> : vector<128x128xf32>
      %26 = tpu.matmul %24, %25, %cst {dimension_numbers = #tpu.dot_dimension_numbers<[1], [0], [0], [1], [0, 0, 1, 1], [], []>} : vector<128x128xbf16>, vector<128x128xbf16>, vector<128x128xf32> -> vector<128x128xf32>
      %27 = arith.addf %23, %26 : vector<128x128xf32>
      %c0_13 = arith.constant 0 : index
      %c0_14 = arith.constant 0 : index
      %28 = vector.load %arg11[%c0_13, %c0_14] : memref<128x128xf32, #tpu.memory_space<vmem>>, vector<128x128xf32>
      tpu.vector_store %arg11[%c0_13, %c0_14], %27 {strides = array<i32>} : memref<128x128xf32, #tpu.memory_space<vmem>>, vector<128x128xf32>,
    } else {
    }
    %c1_i32 = arith.constant 1 : i32
    %13 = arith.subi %1, %c1_i32 : i32
    %14 = arith.cmpi eq, %arg1, %13 : i32
    %15 = arith.extui %14 : i1 to i32
    %c0_i32_5 = arith.constant 0 : i32
    %16 = arith.cmpi ne, %15, %c0_i32_5 : i32
    scf.if %16 {
      %c0 = arith.constant 0 : index
      %c0_8 = arith.constant 0 : index
      %23 = vector.load %arg11[%c0, %c0_8] : memref<128x128xf32, #tpu.memory_space<vmem>>, vector<128x128xf32>
      %c0_9 = arith.constant 0 : index
      %c0_10 = arith.constant 0 : index
      %24 = vector.load %arg7[%c0_9, %c0_10] : memref<1x128xf32, #tpu.memory_space<vmem>>, vector<1x128xf32>
      %25 = vector.broadcast %24 : vector<1x128xf32> to vector<128x128xf32>
      %26 = arith.addf %23, %25 : vector<128x128xf32>
      %c0_11 = arith.constant 0 : index
      %c0_12 = arith.constant 0 : index
      %27 = vector.load %arg12[%c0_11, %c0_12] : memref<8x128xf32, #tpu.memory_space<vmem>>, vector<8x128xf32>
      %c0_13 = arith.constant 0 : index
      %c0_14 = arith.constant 0 : index
      %28 = vector.load %arg6[%c0_13, %c0_14] : memref<8x128xbf16, #tpu.memory_space<vmem>>, vector<8x128xbf16>
      %29 = arith.truncf %26 : vector<128x128xf32> to vector<128x128xbf16>
      %cst = arith.constant dense<0.000000e+00> : vector<8x128xf32>
      %30 = tpu.matmul %28, %29, %cst {dimension_numbers = #tpu.dot_dimension_numbers<[1], [0], [0], [1], [0, 0, 1, 1], [], []>} : vector<8x128xbf16>, vector<128x128xbf16>, vector<8x128xf32> -> vector<8x128xf32>
      %31 = arith.addf %27, %30 : vector<8x128xf32>
      %c0_15 = arith.constant 0 : index
      %c0_16 = arith.constant 0 : index
      %32 = vector.load %arg12[%c0_15, %c0_16] : memref<8x128xf32, #tpu.memory_space<vmem>>, vector<8x128xf32>
      tpu.vector_store %arg12[%c0_15, %c0_16], %31 {strides = array<i32>} : memref<8x128xf32, #tpu.memory_space<vmem>>, vector<8x128xf32>,
    } else {
    }
    %c4_i32 = arith.constant 4 : i32
    %17 = arith.cmpi eq, %arg0, %c4_i32 : i32
    %c1_i32_6 = arith.constant 1 : i32
    %18 = arith.subi %1, %c1_i32_6 : i32
    %19 = arith.cmpi eq, %arg1, %18 : i32
    %20 = arith.andi %17, %19 : i1
    %21 = arith.extui %20 : i1 to i32
    %c0_i32_7 = arith.constant 0 : i32
    %22 = arith.cmpi ne, %21, %c0_i32_7 : i32
    scf.if %22 {
      %c0 = arith.constant 0 : index
      %c0_8 = arith.constant 0 : index
      %23 = vector.load %arg12[%c0, %c0_8] : memref<8x128xf32, #tpu.memory_space<vmem>>, vector<8x128xf32>
      %24 = arith.truncf %23 : vector<8x128xf32> to vector<8x128xbf16>
      %c0_9 = arith.constant 0 : index
      %c0_10 = arith.constant 0 : index
      %25 = vector.load %arg8[%c0_9, %c0_10] : memref<128x128xbf16, #tpu.memory_space<vmem>>, vector<128x128xbf16>
      %cst = arith.constant dense<0.000000e+00> : vector<8x128xf32>
      %26 = tpu.matmul %24, %25, %cst {dimension_numbers = #tpu.dot_dimension_numbers<[1], [0], [0], [1], [0, 0, 1, 1], [], []>} : vector<8x128xbf16>, vector<128x128xbf16>, vector<8x128xf32> -> vector<8x128xf32>
      %c0_11 = arith.constant 0 : index
      %c0_12 = arith.constant 0 : index
      %27 = vector.load %arg9[%c0_11, %c0_12] : memref<1x128xf32, #tpu.memory_space<vmem>>, vector<1x128xf32>
      %28 = vector.broadcast %27 : vector<1x128xf32> to vector<8x128xf32>
      %29 = arith.addf %26, %28 : vector<8x128xf32>
      %c0_13 = arith.constant 0 : index
      %c0_14 = arith.constant 0 : index
      %30 = vector.load %arg10[%c0_13, %c0_14] : memref<8x128xf32, #tpu.memory_space<vmem>>, vector<8x128xf32>
      tpu.vector_store %arg10[%c0_13, %c0_14], %29 {strides = array<i32>} : memref<8x128xf32, #tpu.memory_space<vmem>>, vector<8x128xf32>,
    } else {
    }
    return
  }
  func.func @transform_0(%arg0: i32, %arg1: i32, %arg2: memref<5x3xi32, #tpu.memory_space<smem>>, %arg3: memref<5xi32, #tpu.memory_space<smem>>) -> (i32, i32) {
    %0 = arith.index_cast %arg0 : i32 to index
    %1 = arith.index_cast %arg1 : i32 to index
    %2 = memref.load %arg2[%0, %1] : memref<5x3xi32, #tpu.memory_space<smem>>
    %c0_i32 = arith.constant 0 : i32
    return %arg0, %2 : i32, i32
  }
  func.func @transform_1(%arg0: i32, %arg1: i32, %arg2: memref<5x3xi32, #tpu.memory_space<smem>>, %arg3: memref<5xi32, #tpu.memory_space<smem>>) -> (i32, i32) {
    %0 = arith.index_cast %arg0 : i32 to index
    %1 = arith.index_cast %arg1 : i32 to index
    %2 = memref.load %arg2[%0, %1] : memref<5x3xi32, #tpu.memory_space<smem>>
    %c0_i32 = arith.constant 0 : i32
    %c0_i32_0 = arith.constant 0 : i32
    return %2, %c0_i32 : i32, i32
  }
  func.func @transform_2(%arg0: i32, %arg1: i32, %arg2: memref<5x3xi32, #tpu.memory_space<smem>>, %arg3: memref<5xi32, #tpu.memory_space<smem>>) -> (i32, i32) {
    %c0_i32 = arith.constant 0 : i32
    %c0_i32_0 = arith.constant 0 : i32
    return %c0_i32, %arg0 : i32, i32
  }
  func.func @transform_3(%arg0: i32, %arg1: i32, %arg2: memref<5x3xi32, #tpu.memory_space<smem>>, %arg3: memref<5xi32, #tpu.memory_space<smem>>) -> (i32, i32) {
    %c0_i32 = arith.constant 0 : i32
    %c0_i32_0 = arith.constant 0 : i32
    %c0_i32_1 = arith.constant 0 : i32
    return %c0_i32, %c0_i32_0 : i32, i32
  }
  func.func @transform_4(%arg0: i32, %arg1: i32, %arg2: memref<5x3xi32, #tpu.memory_space<smem>>, %arg3: memref<5xi32, #tpu.memory_space<smem>>) -> (i32, i32) {
    %c0_i32 = arith.constant 0 : i32
    %c0_i32_0 = arith.constant 0 : i32
    %c0_i32_1 = arith.constant 0 : i32
    return %c0_i32, %c0_i32_0 : i32, i32
  }
  func.func @transform_5(%arg0: i32, %arg1: i32, %arg2: memref<5x3xi32, #tpu.memory_space<smem>>, %arg3: memref<5xi32, #tpu.memory_space<smem>>) -> (i32, i32) {
    %c0_i32 = arith.constant 0 : i32
    %c0_i32_0 = arith.constant 0 : i32
    %c0_i32_1 = arith.constant 0 : i32
    return %c0_i32, %c0_i32_0 : i32, i32
  }
  func.func @transform_6(%arg0: i32, %arg1: i32, %arg2: memref<5x3xi32, #tpu.memory_space<smem>>, %arg3: memref<5xi32, #tpu.memory_space<smem>>) -> (i32, i32) {
    %c0_i32 = arith.constant 0 : i32
    %c0_i32_0 = arith.constant 0 : i32
    %c0_i32_1 = arith.constant 0 : i32
    return %c0_i32, %c0_i32_0 : i32, i32
  }
}

</mosaic_0001>

<bundles_post_ra>
// kernel: _gcn_pipeline.3
= control target key start
LH: loop header
LB: loop body
LE: loop exit
PB: predicated region body
PF: predicated region fallthrough
CT: control target
= control target key end

     0   :  { %s1345_s11 = smov [#allocation5]   ;;  %s1346_s12 = smov [#allocation6]   ;;  %s1622_s0 = inlined_call_operand.vmem [shape: s32[5,3], index: 0, kind: input, shape index: {}]   ;;  %s1623_s2 = inlined_call_operand.hbm [shape: bf16[640,640], index: 2, kind: input, shape index: {}]   ;;  %s1624_s3 = inlined_call_operand.vmem [shape: bf16[640,128], index: 3, kind: input, shape index: {}]   ;;  %s1625_s4 = inlined_call_operand.vmem [shape: bf16[8,640], index: 4, kind: input, shape index: {}]   ;;  %s1626_s5 = inlined_call_operand.vmem [shape: f32[1,128], index: 5, kind: input, shape index: {}]   ;;  %s1627_s6 = inlined_call_operand.vmem [shape: bf16[128,128], index: 6, kind: input, shape index: {}]   ;;  %s1628_s7 = inlined_call_operand.vmem [shape: f32[1,128], index: 7, kind: input, shape index: {}]   ;;  %s1629_s8 = inlined_call_operand.hbm [shape: f32[8,128], index: 8, kind: output, shape index: {}]   ;;  %s1630_s1 = inlined_call_operand.vmem [shape: s32[5], index: 1, kind: input, shape index: {}]  }
   0x1   :  { %s14_s29 = sshll.u32 %s1622_s0, 4  ;;  %s19_s10 = sshll.u32 %s1630_s1, 4  ;;  %s15_s29 = int_to_ptr.vmem [resolvable:$true] %s14_s29  ;;  %s20_s10 = int_to_ptr.vmem [resolvable:$true] %s19_s10 }
   0x2   :  { %17 = dma.vmem_to_smem %s15_s29, 128, %s1345_s11, [#allocation4] }
   0x3   :  { %22 = dma.vmem_to_smem %s20_s10, 16, %s1346_s12, [#allocation4] }
   0x4   :  { %1303 = dma.done.wait [#allocation4], 144 }
   0x5   :  { %1304 = vsyncadd [#allocation4], 4294967152 }
   0x6   :  { %25 = sfence }
   0x7   :  { %26 = vsyncpa [#allocation8], 0 }
   0x8   :  { %28 = vsyncpa [#allocation8 + $0x1], 0 }
   0x9   :  { %29 = vsyncpa [#allocation9], 0  ;;  %s1404_s13 = smov 0   ;;  %s1406_s14 = smov 0  }
   0xa   :  { %s1408_s0 = smov 0   ;;  %s1410_s15 = smov 0  }
   0xb   :  { %s1412_s1 = smov 0   ;;  %s1414_s16 = smov 0  }
   0xc   :  { %s1416_s17 = smov 0   ;;  %s1418_s18 = smov 0  }
   0xd LB: > { %1636 = sst [smem:[#allocation16_spill]] %s1335_s16  ;;  %s44_s19 = sadd.s32 1, %s1335_s16  ;;  %s1343_s18 = sphi %s1418_s18, %s35_s18   ;;  %s1339_s17 = sphi %s1416_s17, %s1648_s17   ;;  %s1335_s16 = sphi %s1414_s16, %s1647_s16   ;;  %s1331_s1 = sphi %s1412_s1, %s1646_s1   ;;  %s1327_s15 = sphi %s1410_s15, %s1645_s15   ;;  %s1323_s0 = sphi %s1408_s0, %s1651_s0   ;;  %s1319_s14 = sphi %s1406_s14, %s1650_s14   ;;  %s1315_s13 = sphi %s1404_s13, %s1649_s13  }
   0xe   : > { %1637 = sst [smem:[#allocation17_spill]] %s1339_s17  ;;  %p45_p0 = scmp.ge.s32.totalorder %s44_s19, 3 }
   0xf   : > { %s47_s20 = sadd.s32 1, %s1339_s17  ;;  %s51_s21 = sshra.s32 %s1335_s16, 7 }
  0x10   : > { %s1653_s19 = smov (%p45_p0, %s44_s19), 0  ;;  %s1655_s20 = smov (!%p45_p0, %s47_s20), %s1339_s17 }
  0x11   : > { %1638 = sst [smem:[#allocation18_spill]] %s1653_s19  ;;  %s53_s22 = sadd.s32 %s1339_s17, %s51_s21 }
  0x12   : > { %p49_p1 = scmp.ge.s32.totalorder %s1655_s20, 5  ;;  %s56_s23 = sand.u32 127, %s1335_s16 }
  0x13   : > { %s928_s24 = sshll.u32 %s53_s22, 7  ;;  %s59_s25 = sshra.s32 %s1653_s19, 7 }
  0x14   : > { %s1657_s20 = smov (%p49_p1, %s1655_s20), 0  ;;  %s1631_s26 = sadd.s32 4294967295, %s1343_s18  }
  0x15   : > { %1639 = sst [smem:[#allocation19_spill]] %s1657_s20  ;;  %s64_s27 = sand.u32 127, %s1653_s19 }
  0x16   : > { %s57_s28 = sadd.s32 %s928_s24, %s56_s23  ;;  %s61_s29 = sadd.s32 %s59_s25, %s1657_s20 }
  0x17   : > { %s58_s30 = sld [smem:[#allocation5 + %s57_s28]]  ;;  %s929_s9 = sshll.u32 %s61_s29, 7 }
  0x18   : > { %s65_s10 = sadd.s32 %s929_s9, %s64_s27  ;;  %p79_p2 = scmp.ne.s32.totalorder %s1323_s0, %s1319_s14 }
  0x19   : > { %s66_s11 = sld [smem:[#allocation5 + %s65_s10]]  ;;  %p85_p3 = scmp.ne.s32.totalorder %s1319_s14, %s1315_s13 }
  0x1a   : > { %p80_p4 = scmp.eq.s32.totalorder %s1343_s18, 0  ;;  %p86_p5 = scmp.eq.s32.totalorder %s1631_s26, 0 }
  0x1b   : > { %s67_s21 = ssub.s32 %s1339_s17, %s1657_s20  ;;  %s270_s22 = sand.u32 1, %s1323_s0  }
  0x1c   : > { %p1465_p6 = por %p86_p5, %p85_p3  ;;  %s72_s23 = sadd.s32 1, %s1323_s0 }
  0x1d   : > { %p81_p7 = por %p80_p4, %p79_p2  ;;  %p1112_p8 = scmp.lt.s32.totalorder %s1343_s18, 15 }
  0x1e   : > { %s934_s27 = sshll.u32 %s270_s22, 6  ;;  %s1097_s26 = smul.u32 80, %s1339_s17 }
  0x1f   : > { %s68_s24 = ssub.s32 %s58_s30, %s66_s11  ;;  %p1474_p10 = pnand %p1112_p8, %p81_p7 }
  0x20   : > { %s69_s25 = sor.u32 %s68_s24, %s67_s21  ;;  %s1659_s28 = smov (!%p81_p7, %s57_s28), 0 }
  0x21   : > { %p70_p9 = scmp.eq.s32.totalorder %s69_s25, 0  ;;  %s1663_s28 = smov (!%p1112_p8, %s1659_s28), 0 }
  0x22   : > { %s1098_s29 = scalar_select %p81_p7, [#allocation5], [#allocation11] }
  0x23   : > { %s1479_s9 = scalar_select %p70_p9, %s1323_s0, %s72_s23  }
  0x24   : > { %s1661_s29 = smov (!%p1112_p8, %s1098_s29), [#allocation12]  ;;  %p939_p11 = scmp.ge.s32.totalorder %s1343_s18, 1 }
  0x25   : > { %s282_s10 = sld [smem:[%s1661_s29 + %s1663_s28]]  ;;  %s274_s30 = scalar_lea.vmem [#allocation7], %s934_s27 }
  0x26   : > { %s1483_s11 = sshll.u32 %s274_s30, 4  ;;  %p332_p12 = scmp.lt.s32.totalorder %s1343_s18, 16  ;;  %s293_s11 = int_to_ptr.vmem [resolvable:$true] %s1483_s11 }
  0x27   : > { %s271_s29 = scalar_lea.sflag [#allocation8], %s270_s22  ;;  %p1217_p1 = pneg %p1474_p10 }
  0x28   : > { %p1486_p13 = pnand %p939_p11, %p332_p12 }
  0x2b   : > { %s287_s24 = sadd.s32 %s1097_s26, %s282_s10  ;;  %s1220_s26 = scalar_lea.hbm %s1623_s2, 1600 }
  0x2c   : > { %s938_s23 = sshll.u32 %s287_s24, 2 }
  0x2d   : > { %s289_s19 = scalar_lea.hbm %s1623_s2, %s938_s23 }
  0x2e   : > { %s290_s28 = sshll.u32 %s289_s19, 4  ;;  %s291_s28 = int_to_ptr.hbm [resolvable:$true] %s290_s28 }
  0x2f   : > { %s1213_s17 = sshra.s32 %s291_s28, 4  ;;  %s1214_s17 = int_to_ptr.hbm [resolvable:$true] %s1213_s17 }
  0x30   : > { %s1215_s27 = scalar_lea.hbm %s1214_s17, 64  ;;  %p1221_p4 = scmp.lt.s32.totalorder %s1214_s17, %s1623_s2 }
  0x31   : > { %p1216_p0 = scmp.ne.s32.totalorder %s1214_s17, %s1215_s27  ;;  %p1222_p5 = scmp.lt.s32.totalorder %s1220_s26, %s1215_s27 }
  0x33   : > { %p1218_p2 = pnand %p1217_p1, %p1216_p0  ;;  %p1223_p7 = por %p1222_p5, %p1221_p4 }
  0x35   : > { %p1219_p3 = pneg %p1218_p2 }
  0x37   : > { %p1224_p8 = pnand %p1223_p7, %p1219_p3 }
  0x39   : > { %1227 = shalt.err (!%p1224_p8)
}
  0x3a   : > { %s1347_s19 = smov 320   ;;  %s1348_s20 = smov 64  }
  0x3b   : > { %s1349_s22 = smov 4   ;;  %336 = sbr.rel (%p1486_p13) target bundleno = 666 (0x29a), region = 44 }
  0x3c   : > { %1111 = dma.hbm_to_vmem [thread:$0]  (!%p1474_p10), %s291_s28, 1024, %s293_s11, %s271_s29, %s1347_s19, %s1348_s20, %s1349_s22  }
  0x3d   : > { %s338_s16 = sand.u32 (!%p1486_p13), 1, %s1319_s14  }
  0x3e   : > { %s940_s23 = sshll.u32 (!%p1486_p13), %s338_s16, 6  ;;  %s339_s25 = scalar_lea.sflag (!%p1486_p13), [#allocation8], %s338_s16 }
  0x3f   : > { %s1507_s30 = scalar_lea.vmem (!%p1486_p13), [#allocation7], %s940_s23 }
  0x40   : > { %1306 = dma.done.wait (%p1465_p6), %s339_s25, 1024  }
  0x41   : > { %1308 = vsyncadd (%p1465_p6), %s339_s25, 4294966272  ;;  %s393_s17 = sshra.s32 %s1327_s15, 7  ;;  %s398_s13 = sand.u32 127, %s1327_s15 }
  0x42   : > { %s395_s11 = sadd.s32 %s1331_s1, %s393_s17  ;;  %s1517_s21 = sld [smem:[#allocation6 + %s1331_s1]] }
  0x43   : > { %s941_s28 = sshll.u32 %s395_s11, 7  ;;  %p415_p9 = scmp.lt.s32.totalorder %s1331_s1, 4 }
  0x44   : > { %s399_s29 = sadd.s32 %s941_s28, %s398_s13  ;;  %p420_p10 = scmp.eq.s32.totalorder %s1331_s1, 0 }
  0x45   : > { %s400_s27 = sld [smem:[#allocation5 + %s399_s29]]  ;;  %p421_p11 = scmp.eq.s32.totalorder %s1327_s15, 0 }
  0x46   : > { %s416_s12 = scalar_select %p415_p9, %s1331_s1, 4 }
  0x47   : > { %p422_p6 = pnand %p421_p11, %p420_p10 }
  0x48   : > { %s944_s26 = sshll.u32 %s416_s12, 2 }
  0x49   : > { %s1526_s19 = scalar_lea.vmem %s1625_s4, %s944_s26 }
  0x4b   : > { %s942_s20 = sshll.u32 %s400_s27, 4 }
  0x4c   : > { %p402_p12 = scmp.lt.s32.totalorder %s942_s20, 79  ;;  %425 = sbr.rel (%p422_p6) target bundleno = 83 (0x53), region = 52 }
  0x4e   : > { %s1665_s20 = smov (!%p402_p12, %s942_s20), 79 }
  0x4f   : > { %s943_s22 = sshll.u32 %s1665_s20, 2 }
  0x50   : > { %s1531_s25 = scalar_lea.vmem %s1624_s3, %s943_s22 }
  0x51   : > { %v1350_v0 = vmov 0.0  }
  0x52   : > { %426 = vst [vmem:[#allocation3] sm:$0xff] %v1350_v0 }
  0x53 PF: > { %p945_p13 = scmp.ne.s32.totalorder %s1327_s15, 0 }
  0x55   : > { %429 = sbr.rel (%p945_p13) target bundleno = 107 (0x6b), region = 56 }
  0x5a   : > { %v1351_v1 = vmov 0.0  }
  0x5b   : > { %430 = vst [vmem:[#allocation2 + $0x30] sm:$0xff] %v1351_v1 }
  0x5c   : > { %431 = vst [vmem:[#allocation2] sm:$0xff] %v1351_v1 }
  0x5d   : > { %432 = vst [vmem:[#allocation2 + $0x58] sm:$0xff] %v1351_v1 }
  0x5e   : > { %433 = vst [vmem:[#allocation2 + $0x18] sm:$0xff] %v1351_v1 }
  0x5f   : > { %434 = vst [vmem:[#allocation2 + $0x50] sm:$0xff] %v1351_v1 }
  0x60   : > { %435 = vst [vmem:[#allocation2 + $0x68] sm:$0xff] %v1351_v1 }
  0x61   : > { %436 = vst [vmem:[#allocation2 + $0x8] sm:$0xff] %v1351_v1 }
  0x62   : > { %437 = vst [vmem:[#allocation2 + $0x48] sm:$0xff] %v1351_v1 }
  0x63   : > { %438 = vst [vmem:[#allocation2 + $0x40] sm:$0xff] %v1351_v1 }
  0x64   : > { %439 = vst [vmem:[#allocation2 + $0x20] sm:$0xff] %v1351_v1 }
  0x65   : > { %440 = vst [vmem:[#allocation2 + $0x10] sm:$0xff] %v1351_v1 }
  0x66   : > { %441 = vst [vmem:[#allocation2 + $0x38] sm:$0xff] %v1351_v1 }
  0x67   : > { %442 = vst [vmem:[#allocation2 + $0x60] sm:$0xff] %v1351_v1 }
  0x68   : > { %443 = vst [vmem:[#allocation2 + $0x70] sm:$0xff] %v1351_v1 }
  0x69   : > { %444 = vst [vmem:[#allocation2 + $0x78] sm:$0xff] %v1351_v1 }
  0x6a   : > { %445 = vst [vmem:[#allocation2 + $0x28] sm:$0xff] %v1351_v1 }
  0x6b PF: > { %p946_p0 = scmp.ge.s32.totalorder %s1327_s15, %s1517_s21 }
  0x6d   : > { %449 = sbr.rel (%p946_p0) target bundleno = 307 (0x133), region = 60 }
  0x72   : > { %v1064_v2 = vld [vmem:[%s1531_s25 + $0x38] sm:$0xff]  ;;  %v1063_v3 = vld [vmem:[%s1531_s25 + $0x30] sm:$0xff]  ;;  %v1062_v4 = vld [vmem:[%s1531_s25 + $0x28] sm:$0xff] }
  0x73   : > { %594 = vmatpush.bf16.msra.mxu0 %v1064_v2  ;;  %1073 = vmatpush.bf16.msra.mxu1 %v1064_v2  ;;  %v1061_v5 = vld [vmem:[%s1531_s25 + $0x20] sm:$0xff]  ;;  %v1060_v6 = vld [vmem:[%s1531_s25 + $0x18] sm:$0xff]  ;;  %v1059_v7 = vld [vmem:[%s1531_s25 + $0x10] sm:$0xff] }
  0x74   : > { %1074 = vmatpush.bf16.msra.mxu2 %v1064_v2  ;;  %1075 = vmatpush.bf16.msra.mxu3 %v1064_v2  ;;  %v1058_v8 = vld [vmem:[%s1531_s25 + $0x8] sm:$0xff]  ;;  %v1057_v9 = vld [vmem:[%s1531_s25] sm:$0xff]  ;;  %v1051_v11 = vld [vmem:[%s1507_s30 + $0x10] sm:$0xff] }
  0x75   : > { %v1049_v10 = vld [vmem:[%s1507_s30] sm:$0xff]  ;;  %v1055_v13 = vld [vmem:[%s1507_s30 + $0x30] sm:$0xff]  ;;  %v1050_v14 = vld [vmem:[%s1507_s30 + $0x8] sm:$0xff] }
  0x76   : > { %v1053_v12 = vld [vmem:[%s1507_s30 + $0x20] sm:$0xff]  ;;  %v1052_v15 = vld [vmem:[%s1507_s30 + $0x18] sm:$0xff]  ;;  %v1054_v16 = vld [vmem:[%s1507_s30 + $0x28] sm:$0xff] }
  0x77   : > { %595 = vmatpush.bf16.msra.mxu0 %v1063_v3  ;;  %1076 = vmatpush.bf16.msra.mxu1 %v1063_v3  ;;  %v1056_v17 = vld [vmem:[%s1507_s30 + $0x38] sm:$0xff]  ;;  %v450_v18 = vld [vmem:[#allocation2 + $0x30] sm:$0xff]  ;;  %v455_v27 = vld [vmem:[#allocation2 + $0x68] sm:$0xff] }
  0x78   : > { %1077 = vmatpush.bf16.msra.mxu2 %v1063_v3  ;;  %1078 = vmatpush.bf16.msra.mxu3 %v1063_v3  ;;  %v454_v19 = vld [vmem:[#allocation2 + $0x50] sm:$0xff]  ;;  %v458_v24 = vld [vmem:[#allocation2 + $0x40] sm:$0xff]  ;;  %v452_v38 = vld [vmem:[#allocation2 + $0x58] sm:$0xff] }
  0x79   : > { %v462_v25 = vld [vmem:[#allocation2 + $0x60] sm:$0xff]  ;;  %v463_v37 = vld [vmem:[#allocation2 + $0x70] sm:$0xff]  ;;  %v456_v39 = vld [vmem:[#allocation2 + $0x8] sm:$0xff] }
  0x7a   : > { %v451_v26 = vld [vmem:[#allocation2] sm:$0xff]  ;;  %v460_v48 = vld [vmem:[#allocation2 + $0x10] sm:$0xff]  ;;  %v464_v49 = vld [vmem:[#allocation2 + $0x78] sm:$0xff] }
  0x7b   : > { %596 = vmatpush.bf16.msra.mxu0 %v1062_v4  ;;  %1079 = vmatpush.bf16.msra.mxu1 %v1062_v4  ;;  %v459_v36 = vld [vmem:[#allocation2 + $0x20] sm:$0xff]  ;;  %v453_v50 = vld [vmem:[#allocation2 + $0x18] sm:$0xff]  ;;  %v457_v51 = vld [vmem:[#allocation2 + $0x48] sm:$0xff] }
  0x7c   : > { %1080 = vmatpush.bf16.msra.mxu2 %v1062_v4  ;;  %1081 = vmatpush.bf16.msra.mxu3 %v1062_v4  ;;  %v461_v60 = vld [vmem:[#allocation2 + $0x38] sm:$0xff]  ;;  %v465_v61 = vld [vmem:[#allocation2 + $0x28] sm:$0xff] }
  0x7f   : > { %597 = vmatpush.bf16.msra.mxu0 %v1061_v5  ;;  %1082 = vmatpush.bf16.msra.mxu1 %v1061_v5 }
  0x80   : > { %1083 = vmatpush.bf16.msra.mxu2 %v1061_v5  ;;  %1084 = vmatpush.bf16.msra.mxu3 %v1061_v5 }
  0x83   : > { %598 = vmatpush.bf16.msra.mxu0 %v1060_v6  ;;  %1085 = vmatpush.bf16.msra.mxu1 %v1060_v6 }
  0x84   : > { %1086 = vmatpush.bf16.msra.mxu2 %v1060_v6  ;;  %1087 = vmatpush.bf16.msra.mxu3 %v1060_v6 }
  0x87   : > { %599 = vmatpush.bf16.msra.mxu0 %v1059_v7  ;;  %1088 = vmatpush.bf16.msra.mxu1 %v1059_v7 }
  0x88   : > { %1089 = vmatpush.bf16.msra.mxu2 %v1059_v7  ;;  %1090 = vmatpush.bf16.msra.mxu3 %v1059_v7 }
  0x8b   : > { %600 = vmatpush.bf16.msra.mxu0 %v1058_v8  ;;  %1091 = vmatpush.bf16.msra.mxu1 %v1058_v8 }
  0x8c   : > { %1092 = vmatpush.bf16.msra.mxu2 %v1058_v8  ;;  %1093 = vmatpush.bf16.msra.mxu3 %v1058_v8 }
  0x8f   : > { %601 = vmatpush.bf16.msra.mxu0 %v1057_v9  ;;  %1094 = vmatpush.bf16.msra.mxu1 %v1057_v9 }
  0x90   : > { %1095 = vmatpush.bf16.msra.mxu2 %v1057_v9  ;;  %1096 = vmatpush.bf16.msra.mxu3 %v1057_v9 }
  0x92   : > { %602 = vmatmul.bf16.vlgmr.msra.gmra.mxu0 %v1049_v10  ;;  %612 = vmatmul.bf16.vlgmr.msra.gmra.mxu1 %v1051_v11 }
  0x93   : > { %622 = vmatmul.bf16.vlgmr.msra.gmra.mxu2 %v1053_v12  ;;  %632 = vmatmul.bf16.vlgmr.msra.gmra.mxu3 %v1055_v13 }
  0xa2   : > { %607 = vmatmul.bf16.gmra.mxu0 %v1050_v14  ;;  %617 = vmatmul.bf16.gmra.mxu1 %v1052_v15 }
  0xa3   : > { %627 = vmatmul.bf16.gmra.mxu2 %v1054_v16  ;;  %637 = vmatmul.bf16.gmra.mxu3 %v1056_v17 }
 0x10f   : > { %v603_v20 = vpop.f32.mrf.mxu0  ;;  %v613_v21 = vpop.f32.mrf.mxu1 }
 0x110   : > { %v643_v22 = vadd.f32 %v603_v20, %v450_v18  ;;  %v647_v23 = vadd.f32 %v613_v21, %v454_v19 }
 0x112   : > { %659 = vst [vmem:[#allocation2 + $0x30] sm:$0xff] %v643_v22 }
 0x113   : > { %663 = vst [vmem:[#allocation2 + $0x50] sm:$0xff] %v647_v23 }
 0x116   : > { %v623_v28 = vpop.f32.mrf.mxu2  ;;  %v633_v29 = vpop.f32.mrf.mxu3 }
 0x117   : > { %v651_v30 = vadd.f32 %v623_v28, %v458_v24  ;;  %v655_v31 = vadd.f32 %v633_v29, %v462_v25  ;;  %v605_v32 = vpop.f32.mrf.mxu0  ;;  %v615_v33 = vpop.f32.mrf.mxu1 }
 0x118   : > { %v644_v34 = vadd.f32 %v605_v32, %v451_v26  ;;  %v648_v35 = vadd.f32 %v615_v33, %v455_v27 }
 0x119   : > { %667 = vst [vmem:[#allocation2 + $0x40] sm:$0xff] %v651_v30 }
 0x11a   : > { %671 = vst [vmem:[#allocation2 + $0x60] sm:$0xff] %v655_v31 }
 0x11b   : > { %660 = vst [vmem:[#allocation2] sm:$0xff] %v644_v34 }
 0x11c   : > { %664 = vst [vmem:[#allocation2 + $0x68] sm:$0xff] %v648_v35 }
 0x11e   : > { %v625_v40 = vpop.f32.mrf.mxu2  ;;  %v635_v41 = vpop.f32.mrf.mxu3 }
 0x11f   : > { %v652_v42 = vadd.f32 %v625_v40, %v459_v36  ;;  %v656_v43 = vadd.f32 %v635_v41, %v463_v37  ;;  %v608_v44 = vpop.f32.mrf.mxu0  ;;  %v618_v45 = vpop.f32.mrf.mxu1 }
 0x120   : > { %v645_v46 = vadd.f32 %v608_v44, %v452_v38  ;;  %v649_v47 = vadd.f32 %v618_v45, %v456_v39 }
 0x121   : > { %668 = vst [vmem:[#allocation2 + $0x20] sm:$0xff] %v652_v42 }
 0x122   : > { %672 = vst [vmem:[#allocation2 + $0x70] sm:$0xff] %v656_v43 }
 0x123   : > { %661 = vst [vmem:[#allocation2 + $0x58] sm:$0xff] %v645_v46 }
 0x124   : > { %665 = vst [vmem:[#allocation2 + $0x8] sm:$0xff] %v649_v47 }
 0x126   : > { %v628_v52 = vpop.f32.mrf.mxu2  ;;  %v638_v53 = vpop.f32.mrf.mxu3 }
 0x127   : > { %v653_v54 = vadd.f32 %v628_v52, %v460_v48  ;;  %v657_v55 = vadd.f32 %v638_v53, %v464_v49  ;;  %v610_v56 = vpop.f32.mrf.mxu0  ;;  %v620_v57 = vpop.f32.mrf.mxu1 }
 0x128   : > { %v646_v58 = vadd.f32 %v610_v56, %v453_v50  ;;  %v650_v59 = vadd.f32 %v620_v57, %v457_v51 }
 0x129   : > { %669 = vst [vmem:[#allocation2 + $0x10] sm:$0xff] %v653_v54 }
 0x12a   : > { %673 = vst [vmem:[#allocation2 + $0x78] sm:$0xff] %v657_v55 }
 0x12b   : > { %662 = vst [vmem:[#allocation2 + $0x18] sm:$0xff] %v646_v58 }
 0x12c   : > { %666 = vst [vmem:[#allocation2 + $0x48] sm:$0xff] %v650_v59 }
 0x12e   : > { %v630_v62 = vpop.f32.mrf.mxu2  ;;  %v640_v63 = vpop.f32.mrf.mxu3 }
 0x12f   : > { %v654_v0 = vadd.f32 %v630_v62, %v461_v60  ;;  %v658_v1 = vadd.f32 %v640_v63, %v465_v61 }
 0x131   : > { %670 = vst [vmem:[#allocation2 + $0x38] sm:$0xff] %v654_v0 }
 0x132   : > { %674 = vst [vmem:[#allocation2 + $0x28] sm:$0xff] %v658_v1 }
 0x133 PF: > { %s1011_s30 = sadd.s32 4294967295, %s1517_s21 }
 0x134   : > { %p1554_p1 = scmp.eq.s32.totalorder %s1327_s15, %s1011_s30  ;;  %p1012_p2 = scmp.ne.s32.totalorder %s1327_s15, %s1011_s30 }
 0x136   : > { %679 = sbr.rel (%p1012_p2) target bundleno = 485 (0x1e5), region = 64 }
 0x13b   : > { %v694_v2 = vld [vmem:[#allocation2 + $0x78] sm:$0xff]  ;;  %v695_v3 = vld [vmem:[#allocation2 + $0x28] sm:$0xff]  ;;  %v1187_v4 = vld [vmem:[%s1626_s5] ss:$0 sm:$0xff] }
 0x13c   : > { %v692_v5 = vld [vmem:[#allocation2 + $0x60] sm:$0xff]  ;;  %v693_v6 = vld [vmem:[#allocation2 + $0x70] sm:$0xff]  ;;  %v714_v7 = vadd.f32 %v1187_v4, %v694_v2  ;;  %v715_v8 = vadd.f32 %v1187_v4, %v695_v3  ;;  %v691_v12 = vld [vmem:[#allocation2 + $0x38] sm:$0xff] }
 0x13d   : > { %v712_v9 = vadd.f32 %v1187_v4, %v692_v5  ;;  %v713_v10 = vadd.f32 %v1187_v4, %v693_v6  ;;  %v690_v11 = vld [vmem:[#allocation2 + $0x10] sm:$0xff]  ;;  %v711_v16 = vadd.f32 %v1187_v4, %v691_v12  ;;  %v688_v17 = vld [vmem:[#allocation2 + $0x40] sm:$0xff]  ;;  %v686_v22 = vld [vmem:[#allocation2 + $0x8] sm:$0xff] }
 0x13e   : > { %v725_v13 = vpack.c.bf16 %v715_v8, %v714_v7  ;;  %v710_v15 = vadd.f32 %v1187_v4, %v690_v11  ;;  %v689_v18 = vld [vmem:[#allocation2 + $0x20] sm:$0xff]  ;;  %v708_v20 = vadd.f32 %v1187_v4, %v688_v17  ;;  %v687_v23 = vld [vmem:[#allocation2 + $0x48] sm:$0xff]  ;;  %v706_v25 = vadd.f32 %v1187_v4, %v686_v22  ;;  %v684_v27 = vld [vmem:[#allocation2 + $0x50] sm:$0xff] }
 0x13f   : > { %v724_v14 = vpack.c.bf16 %v713_v10, %v712_v9  ;;  %v709_v21 = vadd.f32 %v1187_v4, %v689_v18  ;;  %v707_v26 = vadd.f32 %v1187_v4, %v687_v23  ;;  %v685_v28 = vld [vmem:[#allocation2 + $0x68] sm:$0xff]  ;;  %v704_v30 = vadd.f32 %v1187_v4, %v684_v27  ;;  %v682_v32 = vld [vmem:[#allocation2 + $0x58] sm:$0xff]  ;;  %v680_v37 = vld [vmem:[#allocation2 + $0x30] sm:$0xff] }
 0x140   : > { %726 = vmatpush.bf16.msra.mxu0 %v725_v13  ;;  %v723_v19 = vpack.c.bf16 %v711_v16, %v710_v15  ;;  %v705_v31 = vadd.f32 %v1187_v4, %v685_v28  ;;  %v683_v33 = vld [vmem:[#allocation2 + $0x18] sm:$0xff]  ;;  %v702_v35 = vadd.f32 %v1187_v4, %v682_v32  ;;  %v681_v38 = vld [vmem:[#allocation2] sm:$0xff]  ;;  %v700_v40 = vadd.f32 %v1187_v4, %v680_v37 }
 0x141   : > { %v722_v24 = vpack.c.bf16 %v709_v21, %v708_v20  ;;  %v721_v29 = vpack.c.bf16 %v707_v26, %v706_v25  ;;  %v703_v36 = vadd.f32 %v1187_v4, %v683_v33  ;;  %v701_v41 = vadd.f32 %v1187_v4, %v681_v38  ;;  %v717_v43 = vld [vmem:[%s1526_s19] sm:$0xf] }
 0x142   : > { %v720_v34 = vpack.c.bf16 %v705_v31, %v704_v30  ;;  %v716_v44 = vld [vmem:[#allocation3] sm:$0xff] }
 0x143   : > { %v719_v39 = vpack.c.bf16 %v703_v36, %v702_v35  ;;  %v718_v42 = vpack.c.bf16 %v701_v41, %v700_v40 }
 0x144   : > { %727 = vmatpush.bf16.msra.mxu0 %v724_v14 }
 0x148   : > { %728 = vmatpush.bf16.msra.mxu0 %v723_v19 }
 0x14c   : > { %729 = vmatpush.bf16.msra.mxu0 %v722_v24 }
 0x150   : > { %730 = vmatpush.bf16.msra.mxu0 %v721_v29 }
 0x154   : > { %731 = vmatpush.bf16.msra.mxu0 %v720_v34 }
 0x158   : > { %732 = vmatpush.bf16.msra.mxu0 %v719_v39 }
 0x15c   : > { %733 = vmatpush.bf16.msra.mxu0 %v718_v42 }
 0x15f   : > { %734 = vmatmul.bf16.vlgmr.msra.gmra.mxu0 %v717_v43 }
 0x1dc   : > { %v735_v45 = vpop.f32.mrf.mxu0 }
 0x1dd   : > { %v739_v46 = vadd.f32 %v735_v45, %v716_v44 }
 0x1df   : > { %740 = vst [vmem:[#allocation3] sm:$0xff] %v739_v46 }
 0x1e4   : > { %v737_v47 = vpop.f32.mrf.mxu0 }
 0x1e5 PF: > { %p741_p3 = scmp.eq.s32.totalorder %s1331_s1, 4 }
 0x1e7   : > { %p742_p4 = pnand %p741_p3, %p1554_p1 }
 0x1e9   : > { %745 = sbr.rel (%p742_p4) target bundleno = 660 (0x294), region = 68 }
 0x1ee   : > { %v1072_v48 = vld [vmem:[%s1627_s6 + $0x38] sm:$0xff]  ;;  %v1071_v49 = vld [vmem:[%s1627_s6 + $0x30] sm:$0xff]  ;;  %v1070_v50 = vld [vmem:[%s1627_s6 + $0x28] sm:$0xff] }
 0x1ef   : > { %816 = vmatpush.bf16.msra.mxu0 %v1072_v48  ;;  %v1069_v51 = vld [vmem:[%s1627_s6 + $0x20] sm:$0xff]  ;;  %v1068_v52 = vld [vmem:[%s1627_s6 + $0x18] sm:$0xff]  ;;  %v1067_v53 = vld [vmem:[%s1627_s6 + $0x10] sm:$0xff] }
 0x1f0   : > { %v1066_v54 = vld [vmem:[%s1627_s6 + $0x8] sm:$0xff]  ;;  %v1065_v55 = vld [vmem:[%s1627_s6] sm:$0xff] }
 0x1f1   : > { %v746_v56 = vld [vmem:[#allocation3] sm:$0xff] }
 0x1f2   : > { %v747_v57 = vpack.c.bf16 %v746_v56, %v746_v56  ;;  %v1188_v58 = vld [vmem:[%s1628_s7] ss:$0 sm:$0xff] }
 0x1f3   : > { %817 = vmatpush.bf16.msra.mxu0 %v1071_v49 }
 0x1f7   : > { %818 = vmatpush.bf16.msra.mxu0 %v1070_v50 }
 0x1fb   : > { %819 = vmatpush.bf16.msra.mxu0 %v1069_v51 }
 0x1ff   : > { %820 = vmatpush.bf16.msra.mxu0 %v1068_v52 }
 0x203   : > { %821 = vmatpush.bf16.msra.mxu0 %v1067_v53 }
 0x207   : > { %822 = vmatpush.bf16.msra.mxu0 %v1066_v54 }
 0x20b   : > { %823 = vmatpush.bf16.msra.mxu0 %v1065_v55 }
 0x20e   : > { %824 = vmatmul.bf16.vlgmr.msra.gmra.mxu0 %v747_v57 }
 0x28b   : > { %v825_v59 = vpop.f32.mrf.mxu0 }
 0x28c   : > { %v826_v60 = vadd.f32 %v1188_v58, %v825_v59 }
 0x28e   : > { %829 = vst [vmem:[#allocation10] sm:$0xff] %v826_v60 }
 0x293   : > { %v827_v61 = vpop.f32.mrf.mxu0 }
 0x294 PF: > { %s1644_s13 = sadd.s32 4294967295, %s1343_s18   ;;  %s838_s21 = sshll.u32 %s1629_s8, 4  ;;  %s839_s21 = int_to_ptr.hbm [resolvable:$true] %s838_s21 }
 0x295   : > { %p1113_p5 = scmp.eq.s32.totalorder %s1644_s13, 14  ;;  %s1352_s28 = smov [#allocation10]  }
 0x296   : > { %s836_s29 = sshll.u32 %s1352_s28, 4  ;;  %s837_s29 = int_to_ptr.vmem [resolvable:$true] %s836_s29 }
 0x297   : > { %1103 = dma.vmem_to_hbm [thread:$0]  (%p1113_p5), %s837_s29, 128, %s839_s21, [#allocation9]  }
 0x298   : > { %1310 = dma.done.wait (%p1113_p5), [#allocation9], 128  }
 0x299   : > { %1312 = vsyncadd (%p1113_p5), [#allocation9], 4294967168 }
 0x29a PF: > { %s35_s18 = sadd.s32 1, %s1343_s18   ;;  %s1645_s15 = sld [smem:[#allocation16_spill]] }
 0x29b   : > { %p32_p7 = scmp.ge.s32.totalorder %s35_s18, 17   ;;  %s1646_s1 = sld [smem:[#allocation17_spill]] }
 0x29c   : > { %s1647_s16 = sld [smem:[#allocation18_spill]]  ;;  %s1649_s13 = smov %s1319_s14 }
 0x29d   : > { %s1648_s17 = sld [smem:[#allocation19_spill]]  ;;  %s1650_s14 = smov %s1323_s0 }
 0x29e   : > { %s1651_s0 = smov %s1479_s9  ;;  %34 = sbr.rel (!%p32_p7) target bundleno = 13 (0xd), region = 107 }
 0x2a3   :  { %852 = vsyncpa [#allocation8], 1 }
 0x2a4   :  { %854 = vsyncpa [#allocation8 + $0x1], 1 }
 0x2a5   :  { %855 = vsyncpa [#allocation9], 1 }
 0x2a6   :  { %857 = vsyncpa [#allocation9 + $0x1], 1 }

// kernel: _gcn_pipeline.2
= control target key start
LH: loop header
LB: loop body
LE: loop exit
PB: predicated region body
PF: predicated region fallthrough
CT: control target
= control target key end

     0   :  { %s1472_s30 = smov [#allocation4]   ;;  %s1473_s8 = smov [#allocation5]   ;;  %s1749_s0 = inlined_call_operand.vmem [shape: s32[5,3], index: 0, kind: input, shape index: {}]   ;;  %s1750_s2 = inlined_call_operand.hbm [shape: bf16[640,640], index: 2, kind: input, shape index: {}]   ;;  %s1751_s3 = inlined_call_operand.vmem [shape: bf16[640,16], index: 3, kind: input, shape index: {}]   ;;  %s1752_s4 = inlined_call_operand.vmem [shape: bf16[16,128], index: 4, kind: input, shape index: {}]   ;;  %s1753_s5 = inlined_call_operand.vmem [shape: f32[1,128], index: 5, kind: input, shape index: {}]   ;;  %s1754_s6 = inlined_call_operand.vmem [shape: bf16[128,128], index: 6, kind: input, shape index: {}]   ;;  %s1755_s7 = inlined_call_operand.vmem [shape: bf16[640,128], index: 7, kind: output, shape index: {}]   ;;  %s1756_s1 = inlined_call_operand.vmem [shape: s32[5], index: 1, kind: input, shape index: {}]  }
   0x1   :  { %s13_s26 = sshll.u32 %s1749_s0, 4  ;;  %s18_s29 = sshll.u32 %s1756_s1, 4  ;;  %s14_s26 = int_to_ptr.vmem [resolvable:$true] %s13_s26  ;;  %s19_s29 = int_to_ptr.vmem [resolvable:$true] %s18_s29 }
   0x2   :  { %16 = dma.vmem_to_smem %s14_s26, 128, %s1472_s30, [#allocation3] }
   0x3   :  { %21 = dma.vmem_to_smem %s19_s29, 16, %s1473_s8, [#allocation3] }
   0x4   :  { %1434 = dma.done.wait [#allocation3], 144 }
   0x5   :  { %1435 = vsyncadd [#allocation3], 4294967152 }
   0x6   :  { %24 = sfence }
   0x7   :  { %25 = vsyncpa [#allocation7], 0 }
   0x8   :  { %27 = vsyncpa [#allocation7 + $0x1], 0  ;;  %s1524_s9 = smov 0   ;;  %s1526_s10 = smov 0  }
   0x9   :  { %s1528_s0 = smov 0   ;;  %s1530_s11 = smov 0  }
   0xa   :  { %s1532_s1 = smov 0   ;;  %s1534_s12 = smov 0  }
   0xb   :  { %s1536_s13 = smov 0   ;;  %s1538_s14 = smov 0  }
   0xc LB: > { %1760 = sst [smem:[#allocation12_spill]] %s1466_s13  ;;  %s42_s15 = sadd.s32 1, %s1462_s12  ;;  %s1470_s14 = sphi %s1538_s14, %s33_s14   ;;  %s1466_s13 = sphi %s1536_s13, %s1768_s13   ;;  %s1462_s12 = sphi %s1534_s12, %s1773_s12   ;;  %s1458_s1 = sphi %s1532_s1, %s1766_s1   ;;  %s1454_s11 = sphi %s1530_s11, %s1772_s11   ;;  %s1450_s0 = sphi %s1528_s0, %s1771_s0   ;;  %s1446_s10 = sphi %s1526_s10, %s1770_s10   ;;  %s1442_s9 = sphi %s1524_s9, %s1769_s9  }
   0xd   : > { %p43_p0 = scmp.ge.s32.totalorder %s42_s15, 3  ;;  %s45_s16 = sadd.s32 1, %s1466_s13 }
   0xe   : > { %s49_s17 = sshra.s32 %s1462_s12, 7  ;;  %s54_s19 = sand.u32 127, %s1462_s12 }
   0xf   : > { %s1775_s15 = smov (%p43_p0, %s42_s15), 0  ;;  %s1777_s16 = smov (!%p43_p0, %s45_s16), %s1466_s13 }
  0x10   : > { %1761 = sst [smem:[#allocation13_spill]] %s1775_s15  ;;  %s51_s18 = sadd.s32 %s1466_s13, %s49_s17 }
  0x11   : > { %p47_p1 = scmp.ge.s32.totalorder %s1777_s16, 5  ;;  %s1028_s20 = sshll.u32 %s51_s18, 7 }
  0x12   : > { %s57_s21 = sshra.s32 %s1775_s15, 7  ;;  %s1026_s22 = sadd.s32 4294967295, %s1470_s14  }
  0x13   : > { %s1779_s16 = smov (%p47_p1, %s1777_s16), 0  ;;  %s62_s23 = sand.u32 127, %s1775_s15 }
  0x14   : > { %1762 = sst [smem:[#allocation14_spill]] %s1779_s16  ;;  %s55_s24 = sadd.s32 %s1028_s20, %s54_s19 }
  0x15   : > { %s59_s25 = sadd.s32 %s57_s21, %s1779_s16  ;;  %s56_s26 = sld [smem:[#allocation4 + %s55_s24]] }
  0x16   : > { %s1029_s27 = sshll.u32 %s59_s25, 7  ;;  %p77_p2 = scmp.ne.s32.totalorder %s1450_s0, %s1446_s10 }
  0x17   : > { %s63_s28 = sadd.s32 %s1029_s27, %s62_s23  ;;  %p83_p3 = scmp.ne.s32.totalorder %s1446_s10, %s1442_s9 }
  0x18   : > { %s64_s29 = sld [smem:[#allocation4 + %s63_s28]]  ;;  %p78_p4 = scmp.eq.s32.totalorder %s1470_s14, 0 }
  0x19   : > { %p84_p5 = scmp.eq.s32.totalorder %s1026_s22, 0  ;;  %s65_s8 = ssub.s32 %s1466_s13, %s1779_s16 }
  0x1a   : > { %s247_s17 = sand.u32 1, %s1450_s0   ;;  %s70_s18 = sadd.s32 1, %s1450_s0 }
  0x1b   : > { %p1583_p6 = por %p84_p5, %p83_p3  ;;  %p79_p7 = por %p78_p4, %p77_p2 }
  0x1c   : > { %p1276_p8 = scmp.lt.s32.totalorder %s1470_s14, 15  ;;  %s1034_s21 = sshll.u32 %s247_s17, 6 }
  0x1d   : > { %s1266_s22 = scalar_select %p79_p7, [#allocation4], [#allocation8] }
  0x1e   : > { %s66_s19 = ssub.s32 %s56_s26, %s64_s29  ;;  %p1592_p10 = pnand %p1276_p8, %p79_p7 }
  0x1f   : > { %s67_s20 = sor.u32 %s66_s19, %s65_s8  ;;  %s1781_s24 = smov (!%p79_p7, %s55_s24), 0 }
  0x20   : > { %p68_p9 = scmp.eq.s32.totalorder %s67_s20, 0  ;;  %s1783_s22 = smov (!%p1276_p8, %s1266_s22), [#allocation9] }
  0x21   : > { %s1785_s24 = smov (!%p1276_p8, %s1781_s24), 0  ;;  %s1265_s27 = smul.u32 80, %s1466_s13 }
  0x22   : > { %s1597_s23 = scalar_select %p68_p9, %s1450_s0, %s70_s18  }
  0x23   : > { %s259_s25 = sld [smem:[%s1783_s22 + %s1785_s24]]  ;;  %p1039_p11 = scmp.ge.s32.totalorder %s1470_s14, 1 }
  0x24   : > { %s251_s26 = scalar_lea.vmem [#allocation6], %s1034_s21  ;;  %p302_p12 = scmp.lt.s32.totalorder %s1470_s14, 16 }
  0x25   : > { %s1601_s28 = sshll.u32 %s251_s26, 4  ;;  %s248_s22 = scalar_lea.sflag [#allocation7], %s247_s17  ;;  %s270_s28 = int_to_ptr.vmem [resolvable:$true] %s1601_s28 }
  0x26   : > { %p1604_p13 = pnand %p1039_p11, %p302_p12  ;;  %p1376_p1 = pneg %p1592_p10 }
  0x29   : > { %s264_s8 = sadd.s32 %s1265_s27, %s259_s25  ;;  %s1379_s25 = scalar_lea.hbm %s1750_s2, 1600 }
  0x2a   : > { %s1038_s18 = sshll.u32 %s264_s8, 2 }
  0x2b   : > { %s266_s16 = scalar_lea.hbm %s1750_s2, %s1038_s18 }
  0x2c   : > { %s267_s24 = sshll.u32 %s266_s16, 4  ;;  %s268_s24 = int_to_ptr.hbm [resolvable:$true] %s267_s24 }
  0x2d   : > { %s1372_s15 = sshra.s32 %s268_s24, 4  ;;  %s1373_s15 = int_to_ptr.hbm [resolvable:$true] %s1372_s15 }
  0x2e   : > { %s1374_s21 = scalar_lea.hbm %s1373_s15, 64  ;;  %p1380_p4 = scmp.lt.s32.totalorder %s1373_s15, %s1750_s2 }
  0x2f   : > { %p1375_p0 = scmp.ne.s32.totalorder %s1373_s15, %s1374_s21  ;;  %p1381_p5 = scmp.lt.s32.totalorder %s1379_s25, %s1374_s21 }
  0x31   : > { %p1377_p2 = pnand %p1376_p1, %p1375_p0  ;;  %p1382_p7 = por %p1381_p5, %p1380_p4 }
  0x33   : > { %p1378_p3 = pneg %p1377_p2 }
  0x35   : > { %p1383_p8 = pnand %p1382_p7, %p1378_p3 }
  0x37   : > { %1386 = shalt.err (!%p1383_p8)
}
  0x38   : > { %s1474_s16 = smov 320   ;;  %s1475_s17 = smov 64  }
  0x39   : > { %s1476_s18 = smov 4   ;;  %306 = sbr.rel (%p1604_p13) target bundleno = 718 (0x2ce), region = 40 }
  0x3a   : > { %1275 = dma.hbm_to_vmem [thread:$0]  (!%p1592_p10), %s268_s24, 1024, %s270_s28, %s248_s22, %s1474_s16, %s1475_s17, %s1476_s18  }
  0x3b   : > { %s308_s13 = sand.u32 (!%p1604_p13), 1, %s1446_s10  }
  0x3c   : > { %s1040_s19 = sshll.u32 (!%p1604_p13), %s308_s13, 6  ;;  %s309_s20 = scalar_lea.sflag (!%p1604_p13), [#allocation7], %s308_s13 }
  0x3d   : > { %s1625_s26 = scalar_lea.vmem (!%p1604_p13), [#allocation6], %s1040_s19 }
  0x3e   : > { %1437 = dma.done.wait (%p1583_p6), %s309_s20, 1024  }
  0x3f   : > { %1439 = vsyncadd (%p1583_p6), %s309_s20, 4294966272  ;;  %s362_s15 = sshra.s32 %s1454_s11, 7  ;;  %s367_s9 = sand.u32 127, %s1454_s11 }
  0x40   : > { %s364_s28 = sadd.s32 %s1458_s1, %s362_s15  ;;  %s1635_s29 = sld [smem:[#allocation5 + %s1458_s1]] }
  0x41   : > { %s1041_s24 = sshll.u32 %s364_s28, 7  ;;  %s1044_s22 = sshll.u32 %s1458_s1, 4 }
  0x42   : > { %s368_s21 = sadd.s32 %s1041_s24, %s367_s9  ;;  %p385_p9 = scmp.lt.s32.totalorder %s1044_s22, 79 }
  0x43   : > { %s369_s25 = sld [smem:[#allocation4 + %s368_s21]]  ;;  %p1046_p10 = scmp.ne.s32.totalorder %s1454_s11, 0 }
  0x44   : > { %s1787_s22 = smov (!%p385_p9, %s1044_s22), 79 }
  0x45   : > { %s1045_s27 = sshll.u32 %s1787_s22, 2 }
  0x46   : > { %s1641_s16 = scalar_lea.vmem %s1755_s7, %s1045_s27 }
  0x49   : > { %s1042_s17 = sshll.u32 %s369_s25, 4 }
  0x4a   : > { %p371_p6 = scmp.lt.s32.totalorder %s1042_s17, 79  ;;  %395 = sbr.rel (%p1046_p10) target bundleno = 96 (0x60), region = 48 }
  0x4c   : > { %s1789_s17 = smov (!%p371_p6, %s1042_s17), 79 }
  0x4d   : > { %s1043_s18 = sshll.u32 %s1789_s17, 2 }
  0x4e   : > { %s1646_s20 = scalar_lea.vmem %s1751_s3, %s1043_s18 }
  0x4f   : > { %v1477_v0 = vmov 0.0  }
  0x50   : > { %396 = vst [vmem:[#allocation2 + $0x30] sm:$0xff] %v1477_v0 }
  0x51   : > { %397 = vst [vmem:[#allocation2] sm:$0xff] %v1477_v0 }
  0x52   : > { %398 = vst [vmem:[#allocation2 + $0x58] sm:$0xff] %v1477_v0 }
  0x53   : > { %399 = vst [vmem:[#allocation2 + $0x18] sm:$0xff] %v1477_v0 }
  0x54   : > { %400 = vst [vmem:[#allocation2 + $0x50] sm:$0xff] %v1477_v0 }
  0x55   : > { %401 = vst [vmem:[#allocation2 + $0x68] sm:$0xff] %v1477_v0 }
  0x56   : > { %402 = vst [vmem:[#allocation2 + $0x8] sm:$0xff] %v1477_v0 }
  0x57   : > { %403 = vst [vmem:[#allocation2 + $0x48] sm:$0xff] %v1477_v0 }
  0x58   : > { %404 = vst [vmem:[#allocation2 + $0x40] sm:$0xff] %v1477_v0 }
  0x59   : > { %405 = vst [vmem:[#allocation2 + $0x20] sm:$0xff] %v1477_v0 }
  0x5a   : > { %406 = vst [vmem:[#allocation2 + $0x10] sm:$0xff] %v1477_v0 }
  0x5b   : > { %407 = vst [vmem:[#allocation2 + $0x38] sm:$0xff] %v1477_v0 }
  0x5c   : > { %408 = vst [vmem:[#allocation2 + $0x60] sm:$0xff] %v1477_v0 }
  0x5d   : > { %409 = vst [vmem:[#allocation2 + $0x70] sm:$0xff] %v1477_v0 }
  0x5e   : > { %410 = vst [vmem:[#allocation2 + $0x78] sm:$0xff] %v1477_v0 }
  0x5f   : > { %411 = vst [vmem:[#allocation2 + $0x28] sm:$0xff] %v1477_v0 }
  0x60 PF: > { %p1047_p11 = scmp.ge.s32.totalorder %s1454_s11, %s1635_s29 }
  0x62   : > { %415 = sbr.rel (%p1047_p11) target bundleno = 517 (0x205), region = 52 }
  0x67   : > { %v1168_v1 = vld [vmem:[%s1752_s4] sm:$0xff]  ;;  %v1165_v3 = vld [vmem:[%s1646_s20 + $0x28] sm:$0xff]  ;;  %vm480_vm0 = vcmask 130048   ;;  %v1166_v5 = vld [vmem:[%s1646_s20 + $0x30] sm:$0xff] }
  0x68   : > { %v1160_v2 = vld [vmem:[%s1646_s20] sm:$0xff]  ;;  %512 = vmatpush.bf16.msra.mxu0 %v1168_v1  ;;  %1232 = vmatpush.bf16.msra.mxu3 %v1168_v1  ;;  %v1161_v4 = vld [vmem:[%s1646_s20 + $0x8] sm:$0xff]  ;;  %v1162_v6 = vld [vmem:[%s1646_s20 + $0x10] sm:$0xff] }
  0x69   : > { %v1167_v7 = vld [vmem:[%s1646_s20 + $0x38] sm:$0xff]  ;;  %v1164_v9 = vld [vmem:[%s1646_s20 + $0x20] sm:$0xff]  ;;  %v1170_v36 = vld [vmem:[%s1625_s26 + $0x8] sm:$0xff] }
  0x6a   : > { %v1163_v8 = vld [vmem:[%s1646_s20 + $0x18] sm:$0xff]  ;;  %v1169_v34 = vld [vmem:[%s1625_s26] sm:$0xff]  ;;  %v1174_v37 = vld [vmem:[%s1625_s26 + $0x28] sm:$0xff] }
  0x6b   : > { %1084 = vmatmul.msk.bf16.vlgmr.msra.gmra.mxu0 %vm480_vm0, %v1160_v2  ;;  %1089 = vmatmul.msk.bf16.vlgmr.msra.gmra.mxu3 %vm480_vm0, %v1165_v3  ;;  %v1173_v35 = vld [vmem:[%s1625_s26 + $0x20] sm:$0xff]  ;;  %v1171_v38 = vld [vmem:[%s1625_s26 + $0x10] sm:$0xff]  ;;  %v1172_v40 = vld [vmem:[%s1625_s26 + $0x18] sm:$0xff] }
  0x6c   : > { %v1175_v39 = vld [vmem:[%s1625_s26 + $0x30] sm:$0xff]  ;;  %v1176_v41 = vld [vmem:[%s1625_s26 + $0x38] sm:$0xff]  ;;  %v562_v45 = vld [vmem:[#allocation2 + $0x40] sm:$0xff] }
  0x6d   : > { %v554_v42 = vld [vmem:[#allocation2 + $0x30] sm:$0xff]  ;;  %v555_v47 = vld [vmem:[#allocation2] sm:$0xff]  ;;  %v556_v53 = vld [vmem:[#allocation2 + $0x58] sm:$0xff] }
  0x6e   : > { %v563_v51 = vld [vmem:[#allocation2 + $0x20] sm:$0xff]  ;;  %v564_v57 = vld [vmem:[#allocation2 + $0x10] sm:$0xff]  ;;  %v557_v59 = vld [vmem:[#allocation2 + $0x18] sm:$0xff] }
  0x6f   : > { %v565_v63 = vld [vmem:[#allocation2 + $0x38] sm:$0xff]  ;;  %v558_v1 = vld [vmem:[#allocation2 + $0x50] sm:$0xff] }
  0x7b   : > { %1085 = vmatmul.msk.bf16.gmra.mxu0 %vm480_vm0, %v1161_v4  ;;  %1090 = vmatmul.msk.bf16.gmra.mxu3 %vm480_vm0, %v1166_v5  ;;  %v566_v5 = vld [vmem:[#allocation2 + $0x60] sm:$0xff] }
  0x8b   : > { %1086 = vmatmul.msk.bf16.gmra.mxu0 %vm480_vm0, %v1162_v6  ;;  %1091 = vmatmul.msk.bf16.gmra.mxu3 %vm480_vm0, %v1167_v7  ;;  %v559_v7 = vld [vmem:[#allocation2 + $0x68] sm:$0xff] }
  0x9b   : > { %1087 = vmatmul.msk.bf16.gmra.mxu0 %vm480_vm0, %v1163_v8 }
  0xab   : > { %1088 = vmatmul.msk.bf16.gmra.mxu0 %vm480_vm0, %v1164_v9 }
  0xe8   : > { %v514_v10 = vpop.f32.mrf.mxu0 }
  0xee   : > { %v539_v11 = vpop.f32.mrf.mxu3 }
  0xf0   : > { %v516_v12 = vpop.f32.mrf.mxu0 }
  0xf1   : > { %v586_v13 = vpack.c.bf16 %v516_v12, %v514_v10 }
  0xf6   : > { %v541_v14 = vpop.f32.mrf.mxu3 }
  0xf7   : > { %v591_v26 = vpack.c.bf16 %v541_v14, %v539_v11  ;;  %v567_v11 = vld [vmem:[#allocation2 + $0x70] sm:$0xff] }
  0xf8   : > { %v519_v15 = vpop.f32.mrf.mxu0 }
  0xfe   : > { %v544_v16 = vpop.f32.mrf.mxu3 }
 0x100   : > { %v521_v17 = vpop.f32.mrf.mxu0 }
 0x101   : > { %v587_v33 = vpack.c.bf16 %v521_v17, %v519_v15  ;;  %v568_v17 = vld [vmem:[#allocation2 + $0x78] sm:$0xff] }
 0x106   : > { %v546_v18 = vpop.f32.mrf.mxu3 }
 0x107   : > { %v592_v25 = vpack.c.bf16 %v546_v18, %v544_v16 }
 0x108   : > { %v524_v19 = vpop.f32.mrf.mxu0 }
 0x10e   : > { %v549_v20 = vpop.f32.mrf.mxu3 }
 0x110   : > { %v526_v21 = vpop.f32.mrf.mxu0 }
 0x111   : > { %v588_v32 = vpack.c.bf16 %v526_v21, %v524_v19  ;;  %v561_v19 = vld [vmem:[#allocation2 + $0x48] sm:$0xff] }
 0x116   : > { %v551_v22 = vpop.f32.mrf.mxu3 }
 0x117   : > { %v593_v23 = vpack.c.bf16 %v551_v22, %v549_v20 }
 0x118   : > { %v529_v24 = vpop.f32.mrf.mxu0 }
 0x119   : > { %642 = vmatpush.bf16.msra.mxu1 %v593_v23  ;;  %1233 = vmatpush.bf16.msra.mxu2 %v593_v23  ;;  %v569_v23 = vld [vmem:[#allocation2 + $0x28] sm:$0xff] }
 0x11d   : > { %643 = vmatpush.bf16.msra.mxu1 %v592_v25  ;;  %1234 = vmatpush.bf16.msra.mxu2 %v592_v25 }
 0x120   : > { %v531_v27 = vpop.f32.mrf.mxu0 }
 0x121   : > { %644 = vmatpush.bf16.msra.mxu1 %v591_v26  ;;  %1235 = vmatpush.bf16.msra.mxu2 %v591_v26  ;;  %v589_v31 = vpack.c.bf16 %v531_v27, %v529_v24 }
 0x128   : > { %v534_v28 = vpop.f32.mrf.mxu0 }
 0x130   : > { %v536_v29 = vpop.f32.mrf.mxu0 }
 0x131   : > { %v590_v30 = vpack.c.bf16 %v536_v29, %v534_v28 }
 0x133   : > { %645 = vmatpush.bf16.msra.mxu1 %v590_v30  ;;  %1236 = vmatpush.bf16.msra.mxu2 %v590_v30 }
 0x137   : > { %646 = vmatpush.bf16.msra.mxu1 %v589_v31  ;;  %1237 = vmatpush.bf16.msra.mxu2 %v589_v31 }
 0x13b   : > { %647 = vmatpush.bf16.msra.mxu1 %v588_v32  ;;  %1238 = vmatpush.bf16.msra.mxu2 %v588_v32 }
 0x13f   : > { %648 = vmatpush.bf16.msra.mxu1 %v587_v33  ;;  %1239 = vmatpush.bf16.msra.mxu2 %v587_v33 }
 0x143   : > { %649 = vmatpush.bf16.msra.mxu1 %v586_v13  ;;  %1240 = vmatpush.bf16.msra.mxu2 %v586_v13  ;;  %v560_v13 = vld [vmem:[#allocation2 + $0x8] sm:$0xff] }
 0x146   : > { %650 = vmatmul.bf16.vlgmr.msra.gmra.mxu1 %v1169_v34  ;;  %670 = vmatmul.bf16.vlgmr.msra.gmra.mxu2 %v1173_v35 }
 0x156   : > { %655 = vmatmul.bf16.gmra.mxu1 %v1170_v36  ;;  %675 = vmatmul.bf16.gmra.mxu2 %v1174_v37 }
 0x166   : > { %660 = vmatmul.bf16.gmra.mxu1 %v1171_v38  ;;  %680 = vmatmul.bf16.gmra.mxu2 %v1175_v39 }
 0x176   : > { %665 = vmatmul.bf16.gmra.mxu1 %v1172_v40  ;;  %685 = vmatmul.bf16.gmra.mxu2 %v1176_v41 }
 0x1c3   : > { %v651_v43 = vpop.f32.mrf.mxu1 }
 0x1c4   : > { %v691_v44 = vadd.f32 %v651_v43, %v554_v42 }
 0x1c6   : > { %707 = vst [vmem:[#allocation2 + $0x30] sm:$0xff] %v691_v44 }
 0x1c9   : > { %v671_v46 = vpop.f32.mrf.mxu2 }
 0x1ca   : > { %v699_v48 = vadd.f32 %v671_v46, %v562_v45 }
 0x1cb   : > { %v653_v49 = vpop.f32.mrf.mxu1 }
 0x1cc   : > { %715 = vst [vmem:[#allocation2 + $0x40] sm:$0xff] %v699_v48  ;;  %v692_v50 = vadd.f32 %v653_v49, %v555_v47 }
 0x1ce   : > { %708 = vst [vmem:[#allocation2] sm:$0xff] %v692_v50 }
 0x1d1   : > { %v673_v52 = vpop.f32.mrf.mxu2 }
 0x1d2   : > { %v700_v54 = vadd.f32 %v673_v52, %v563_v51 }
 0x1d3   : > { %v656_v55 = vpop.f32.mrf.mxu1 }
 0x1d4   : > { %716 = vst [vmem:[#allocation2 + $0x20] sm:$0xff] %v700_v54  ;;  %v693_v56 = vadd.f32 %v656_v55, %v556_v53 }
 0x1d6   : > { %709 = vst [vmem:[#allocation2 + $0x58] sm:$0xff] %v693_v56 }
 0x1d9   : > { %v676_v58 = vpop.f32.mrf.mxu2 }
 0x1da   : > { %v701_v60 = vadd.f32 %v676_v58, %v564_v57 }
 0x1db   : > { %v658_v61 = vpop.f32.mrf.mxu1 }
 0x1dc   : > { %717 = vst [vmem:[#allocation2 + $0x10] sm:$0xff] %v701_v60  ;;  %v694_v62 = vadd.f32 %v658_v61, %v557_v59 }
 0x1de   : > { %710 = vst [vmem:[#allocation2 + $0x18] sm:$0xff] %v694_v62 }
 0x1e1   : > { %v678_v0 = vpop.f32.mrf.mxu2 }
 0x1e2   : > { %v702_v2 = vadd.f32 %v678_v0, %v565_v63 }
 0x1e3   : > { %v661_v3 = vpop.f32.mrf.mxu1 }
 0x1e4   : > { %718 = vst [vmem:[#allocation2 + $0x38] sm:$0xff] %v702_v2  ;;  %v695_v4 = vadd.f32 %v661_v3, %v558_v1 }
 0x1e6   : > { %711 = vst [vmem:[#allocation2 + $0x50] sm:$0xff] %v695_v4 }
 0x1e9   : > { %v681_v6 = vpop.f32.mrf.mxu2 }
 0x1ea   : > { %v703_v8 = vadd.f32 %v681_v6, %v566_v5 }
 0x1eb   : > { %v663_v9 = vpop.f32.mrf.mxu1 }
 0x1ec   : > { %719 = vst [vmem:[#allocation2 + $0x60] sm:$0xff] %v703_v8  ;;  %v696_v10 = vadd.f32 %v663_v9, %v559_v7 }
 0x1ee   : > { %712 = vst [vmem:[#allocation2 + $0x68] sm:$0xff] %v696_v10 }
 0x1f1   : > { %v683_v12 = vpop.f32.mrf.mxu2 }
 0x1f2   : > { %v704_v14 = vadd.f32 %v683_v12, %v567_v11 }
 0x1f3   : > { %v666_v15 = vpop.f32.mrf.mxu1 }
 0x1f4   : > { %720 = vst [vmem:[#allocation2 + $0x70] sm:$0xff] %v704_v14  ;;  %v697_v16 = vadd.f32 %v666_v15, %v560_v13 }
 0x1f6   : > { %713 = vst [vmem:[#allocation2 + $0x8] sm:$0xff] %v697_v16 }
 0x1f9   : > { %v686_v18 = vpop.f32.mrf.mxu2 }
 0x1fa   : > { %v705_v20 = vadd.f32 %v686_v18, %v568_v17 }
 0x1fb   : > { %v668_v21 = vpop.f32.mrf.mxu1 }
 0x1fc   : > { %721 = vst [vmem:[#allocation2 + $0x78] sm:$0xff] %v705_v20  ;;  %v698_v22 = vadd.f32 %v668_v21, %v561_v19 }
 0x1fe   : > { %714 = vst [vmem:[#allocation2 + $0x48] sm:$0xff] %v698_v22 }
 0x201   : > { %v688_v24 = vpop.f32.mrf.mxu2 }
 0x202   : > { %v706_v25 = vadd.f32 %v688_v24, %v569_v23 }
 0x204   : > { %722 = vst [vmem:[#allocation2 + $0x28] sm:$0xff] %v706_v25 }
 0x205 PF: > { %s1124_s26 = sadd.s32 4294967295, %s1635_s29 }
 0x206   : > { %p1125_p12 = scmp.ne.s32.totalorder %s1454_s11, %s1124_s26 }
 0x208   : > { %727 = sbr.rel (%p1125_p12) target bundleno = 718 (0x2ce), region = 56 }
 0x20d   : > { %v1184_v26 = vld [vmem:[%s1754_s6 + $0x38] sm:$0xff]  ;;  %v1183_v27 = vld [vmem:[%s1754_s6 + $0x30] sm:$0xff]  ;;  %v1182_v28 = vld [vmem:[%s1754_s6 + $0x28] sm:$0xff] }
 0x20e   : > { %852 = vmatpush.bf16.msra.mxu0 %v1184_v26  ;;  %1241 = vmatpush.bf16.msra.mxu1 %v1184_v26  ;;  %v1181_v29 = vld [vmem:[%s1754_s6 + $0x20] sm:$0xff]  ;;  %v1180_v30 = vld [vmem:[%s1754_s6 + $0x18] sm:$0xff]  ;;  %v1179_v32 = vld [vmem:[%s1754_s6 + $0x10] sm:$0xff] }
 0x20f   : > { %1242 = vmatpush.bf16.msra.mxu2 %v1184_v26  ;;  %1243 = vmatpush.bf16.msra.mxu3 %v1184_v26  ;;  %v1690_v31 = vld [vmem:[%s1753_s5] ss:$0 sm:$0xff]  ;;  %v728_v33 = vld [vmem:[#allocation2 + $0x30] sm:$0xff]  ;;  %v733_v36 = vld [vmem:[#allocation2 + $0x68] sm:$0xff] }
 0x210   : > { %v729_v34 = vld [vmem:[#allocation2] sm:$0xff]  ;;  %v732_v35 = vld [vmem:[#allocation2 + $0x50] sm:$0xff]  ;;  %v748_v41 = vadd.f32 %v1690_v31, %v728_v33  ;;  %v753_v44 = vadd.f32 %v1690_v31, %v733_v36  ;;  %v1178_v46 = vld [vmem:[%s1754_s6 + $0x8] sm:$0xff] }
 0x211   : > { %v736_v37 = vld [vmem:[#allocation2 + $0x40] sm:$0xff]  ;;  %v741_v40 = vld [vmem:[#allocation2 + $0x70] sm:$0xff]  ;;  %v749_v42 = vadd.f32 %v1690_v31, %v729_v34  ;;  %v752_v43 = vadd.f32 %v1690_v31, %v732_v35  ;;  %v730_v63 = vld [vmem:[#allocation2 + $0x58] sm:$0xff] }
 0x212   : > { %853 = vmatpush.bf16.msra.mxu0 %v1183_v27  ;;  %1244 = vmatpush.bf16.msra.mxu1 %v1183_v27  ;;  %v737_v38 = vld [vmem:[#allocation2 + $0x20] sm:$0xff]  ;;  %v756_v45 = vadd.f32 %v1690_v31, %v736_v37  ;;  %v761_v49 = vadd.f32 %v1690_v31, %v741_v40  ;;  %v764_v50 = vmax.f32 %v748_v41, 0.0  ;;  %v769_v53 = vmax.f32 %v753_v44, 0.0  ;;  %v731_v0 = vld [vmem:[#allocation2 + $0x18] sm:$0xff]  ;;  %v734_v1 = vld [vmem:[#allocation2 + $0x8] sm:$0xff] }
 0x213   : > { %1245 = vmatpush.bf16.msra.mxu2 %v1183_v27  ;;  %1246 = vmatpush.bf16.msra.mxu3 %v1183_v27  ;;  %v740_v39 = vld [vmem:[#allocation2 + $0x60] sm:$0xff]  ;;  %v757_v47 = vadd.f32 %v1690_v31, %v737_v38  ;;  %v765_v51 = vmax.f32 %v749_v42, 0.0  ;;  %v768_v52 = vmax.f32 %v752_v43, 0.0  ;;  %v735_v2 = vld [vmem:[#allocation2 + $0x48] sm:$0xff]  ;;  %v738_v3 = vld [vmem:[#allocation2 + $0x10] sm:$0xff]  ;;  %v750_v7 = vadd.f32 %v1690_v31, %v730_v63 }
 0x214   : > { %v760_v48 = vadd.f32 %v1690_v31, %v740_v39  ;;  %v1177_v54 = vld [vmem:[%s1754_s6] sm:$0xff]  ;;  %v772_v55 = vmax.f32 %v756_v45, 0.0  ;;  %v777_v58 = vmax.f32 %v761_v49, 0.0  ;;  %v739_v4 = vld [vmem:[#allocation2 + $0x38] sm:$0xff]  ;;  %v743_v6 = vld [vmem:[#allocation2 + $0x28] sm:$0xff]  ;;  %v751_v8 = vadd.f32 %v1690_v31, %v731_v0 }
 0x215   : > { %v773_v56 = vmax.f32 %v757_v47, 0.0  ;;  %v780_v59 = vpack.c.bf16 %v765_v51, %v764_v50  ;;  %v782_v60 = vpack.c.bf16 %v769_v53, %v768_v52  ;;  %v742_v5 = vld [vmem:[#allocation2 + $0x78] sm:$0xff]  ;;  %v754_v9 = vadd.f32 %v1690_v31, %v734_v1 }
 0x216   : > { %854 = vmatpush.bf16.msra.mxu0 %v1182_v28  ;;  %1247 = vmatpush.bf16.msra.mxu1 %v1182_v28  ;;  %v776_v57 = vmax.f32 %v760_v48, 0.0  ;;  %v755_v10 = vadd.f32 %v1690_v31, %v735_v2  ;;  %v758_v11 = vadd.f32 %v1690_v31, %v738_v3  ;;  %v759_v12 = vadd.f32 %v1690_v31, %v739_v4 }
 0x217   : > { %1248 = vmatpush.bf16.msra.mxu2 %v1182_v28  ;;  %1249 = vmatpush.bf16.msra.mxu3 %v1182_v28  ;;  %v784_v61 = vpack.c.bf16 %v773_v56, %v772_v55  ;;  %v762_v13 = vadd.f32 %v1690_v31, %v742_v5  ;;  %v763_v14 = vadd.f32 %v1690_v31, %v743_v6  ;;  %v766_v15 = vmax.f32 %v750_v7, 0.0 }
 0x218   : > { %v786_v62 = vpack.c.bf16 %v777_v58, %v776_v57  ;;  %v767_v16 = vmax.f32 %v751_v8, 0.0  ;;  %v770_v17 = vmax.f32 %v754_v9, 0.0  ;;  %v771_v18 = vmax.f32 %v755_v10, 0.0 }
 0x219   : > { %v774_v19 = vmax.f32 %v758_v11, 0.0  ;;  %v775_v20 = vmax.f32 %v759_v12, 0.0  ;;  %v778_v21 = vmax.f32 %v762_v13, 0.0  ;;  %v779_v22 = vmax.f32 %v763_v14, 0.0 }
 0x21a   : > { %855 = vmatpush.bf16.msra.mxu0 %v1181_v29  ;;  %1250 = vmatpush.bf16.msra.mxu1 %v1181_v29  ;;  %v781_v23 = vpack.c.bf16 %v767_v16, %v766_v15  ;;  %v783_v24 = vpack.c.bf16 %v771_v18, %v770_v17 }
 0x21b   : > { %1251 = vmatpush.bf16.msra.mxu2 %v1181_v29  ;;  %1252 = vmatpush.bf16.msra.mxu3 %v1181_v29  ;;  %v785_v25 = vpack.c.bf16 %v775_v20, %v774_v19  ;;  %v787_v26 = vpack.c.bf16 %v779_v22, %v778_v21 }
 0x21e   : > { %856 = vmatpush.bf16.msra.mxu0 %v1180_v30  ;;  %1253 = vmatpush.bf16.msra.mxu1 %v1180_v30 }
 0x21f   : > { %1254 = vmatpush.bf16.msra.mxu2 %v1180_v30  ;;  %1255 = vmatpush.bf16.msra.mxu3 %v1180_v30 }
 0x222   : > { %857 = vmatpush.bf16.msra.mxu0 %v1179_v32  ;;  %1256 = vmatpush.bf16.msra.mxu1 %v1179_v32 }
 0x223   : > { %1257 = vmatpush.bf16.msra.mxu2 %v1179_v32  ;;  %1258 = vmatpush.bf16.msra.mxu3 %v1179_v32 }
 0x226   : > { %858 = vmatpush.bf16.msra.mxu0 %v1178_v46  ;;  %1259 = vmatpush.bf16.msra.mxu1 %v1178_v46 }
 0x227   : > { %1260 = vmatpush.bf16.msra.mxu2 %v1178_v46  ;;  %1261 = vmatpush.bf16.msra.mxu3 %v1178_v46 }
 0x22a   : > { %859 = vmatpush.bf16.msra.mxu0 %v1177_v54  ;;  %1262 = vmatpush.bf16.msra.mxu1 %v1177_v54 }
 0x22b   : > { %1263 = vmatpush.bf16.msra.mxu2 %v1177_v54  ;;  %1264 = vmatpush.bf16.msra.mxu3 %v1177_v54 }
 0x22d   : > { %860 = vmatmul.bf16.vlgmr.msra.gmra.mxu0 %v780_v59  ;;  %870 = vmatmul.bf16.vlgmr.msra.gmra.mxu1 %v782_v60 }
 0x22e   : > { %880 = vmatmul.bf16.vlgmr.msra.gmra.mxu2 %v784_v61  ;;  %890 = vmatmul.bf16.vlgmr.msra.gmra.mxu3 %v786_v62 }
 0x23d   : > { %865 = vmatmul.bf16.gmra.mxu0 %v781_v23  ;;  %875 = vmatmul.bf16.gmra.mxu1 %v783_v24 }
 0x23e   : > { %885 = vmatmul.bf16.gmra.mxu2 %v785_v25  ;;  %895 = vmatmul.bf16.gmra.mxu3 %v787_v26 }
 0x2aa   : > { %v861_v27 = vpop.f32.mrf.mxu0  ;;  %v871_v28 = vpop.f32.mrf.mxu1 }
 0x2b1   : > { %v881_v29 = vpop.f32.mrf.mxu2  ;;  %v891_v30 = vpop.f32.mrf.mxu3 }
 0x2b2   : > { %v863_v31 = vpop.f32.mrf.mxu0  ;;  %v873_v32 = vpop.f32.mrf.mxu1 }
 0x2b3   : > { %v1188_v33 = vpack.c.bf16 %v863_v31, %v861_v27  ;;  %v1198_v34 = vpack.c.bf16 %v873_v32, %v871_v28 }
 0x2b5   : > { %1189 = vst [vmem:[%s1641_s16] sm:$0xff] %v1188_v33  }
 0x2b6   : > { %1226 = vst [vmem:[%s1641_s16 + $0x10] sm:$0xff] %v1198_v34  }
 0x2b9   : > { %v883_v35 = vpop.f32.mrf.mxu2  ;;  %v893_v36 = vpop.f32.mrf.mxu3 }
 0x2ba   : > { %v1208_v37 = vpack.c.bf16 %v883_v35, %v881_v29  ;;  %v1218_v38 = vpack.c.bf16 %v893_v36, %v891_v30  ;;  %v866_v39 = vpop.f32.mrf.mxu0  ;;  %v876_v40 = vpop.f32.mrf.mxu1 }
 0x2bc   : > { %1228 = vst [vmem:[%s1641_s16 + $0x20] sm:$0xff] %v1208_v37  }
 0x2bd   : > { %1230 = vst [vmem:[%s1641_s16 + $0x30] sm:$0xff] %v1218_v38  }
 0x2c1   : > { %v886_v41 = vpop.f32.mrf.mxu2  ;;  %v896_v42 = vpop.f32.mrf.mxu3 }
 0x2c2   : > { %v868_v43 = vpop.f32.mrf.mxu0  ;;  %v878_v44 = vpop.f32.mrf.mxu1 }
 0x2c3   : > { %v1193_v45 = vpack.c.bf16 %v868_v43, %v866_v39  ;;  %v1203_v46 = vpack.c.bf16 %v878_v44, %v876_v40 }
 0x2c5   : > { %1225 = vst [vmem:[%s1641_s16 + $0x8] sm:$0xff] %v1193_v45  }
 0x2c6   : > { %1227 = vst [vmem:[%s1641_s16 + $0x18] sm:$0xff] %v1203_v46  }
 0x2c9   : > { %v888_v47 = vpop.f32.mrf.mxu2  ;;  %v898_v48 = vpop.f32.mrf.mxu3 }
 0x2ca   : > { %v1213_v49 = vpack.c.bf16 %v888_v47, %v886_v41  ;;  %v1223_v50 = vpack.c.bf16 %v898_v48, %v896_v42 }
 0x2cc   : > { %1229 = vst [vmem:[%s1641_s16 + $0x28] sm:$0xff] %v1213_v49  }
 0x2cd   : > { %1231 = vst [vmem:[%s1641_s16 + $0x38] sm:$0xff] %v1223_v50  }
 0x2ce PF: > { %s33_s14 = sadd.s32 1, %s1470_s14   ;;  %s1766_s1 = sld [smem:[#allocation12_spill]] }
 0x2cf   : > { %p30_p13 = scmp.ge.s32.totalorder %s33_s14, 17   ;;  %s1767_s26 = sld [smem:[#allocation13_spill]] }
 0x2d0   : > { %s1768_s13 = sld [smem:[#allocation14_spill]]  ;;  %s1769_s9 = smov %s1446_s10 }
 0x2d1   : > { %s1770_s10 = smov %s1450_s0  ;;  %s1771_s0 = smov %s1597_s23 }
 0x2d2   : > { %s1772_s11 = smov %s1462_s12  ;;  %32 = sbr.rel (!%p30_p13) target bundleno = 12 (0xc), region = 95 }
 0x2d5   : > { %s1773_s12 = smov %s1767_s26 }
 0x2d7   :  { %955 = vsyncpa [#allocation7], 1 }
 0x2d8   :  { %957 = vsyncpa [#allocation7 + $0x1], 1 }

</bundles_post_ra>
